<compile_context>
chip_gen: v6e
topology: v6e:2x2x1
jax: 0.10.0
libtpu: 0.0.40
codegen_flags: <defaults>
</compile_context>

<pallas_src>
import functools

import jax
import jax.numpy as jnp
from jax import lax
from jax.experimental import pallas as pl
from jax.experimental.pallas import tpu as pltpu


_LANE = 128      # vreg lane count; chunk size over (h, w) positions
_SUBLANE = 8


def _round_up(a, b):
    return -(-a // b) * b


def _aligned(off):
    """128-alignment hint for dynamic offsets; pass-through for Python ints."""
    if isinstance(off, int):
        return off
    return pl.multiple_of(off, _LANE)


def _preprocess_kernel(x_ref, s_ref, o_ref, *, n_channels, hw_pad, n_chunks,
                       input_is_uint8):
    """One grid step: de-interleave + scale a block of frames.

    x_ref : (f_blk, C*hw_pad)      input rows, (h, w, c)-interleaved, lane-dense
    s_ref : (128*C, C*128)  bf16   one-hot chunk-local channel-selection matrix
    o_ref : (f_blk, C*hw_pad)      output rows, (c, h, w) order, lane-dense
    """
    C = n_channels
    sel = s_ref[...]                                   # bf16 one-hot

    def do_chunk(j):
        in_off = _aligned(j * (_LANE * C))             # multiple of 128
        xc = x_ref[:, pl.ds(in_off, _LANE * C)]        # (f_blk, 128*C)

        if input_is_uint8:
            # Integers 0..255 are exactly representable in bf16 -> one exact
            # MXU pass; fuse the 1/255 scale on the dense result.
            xb = xc.astype(jnp.float32).astype(jnp.bfloat16)
            y = jnp.dot(xb, sel, preferred_element_type=jnp.float32)
            y = y * jnp.float32(1.0 / 255.0)
        else:
            # Exact f32 selection: split x into three bf16-exact pieces
            # (hi + mid + lo == x), select each on the MXU, sum in f32.
            xf = xc
            hi = xf.astype(jnp.bfloat16)
            r1 = xf - hi.astype(jnp.float32)
            mid = r1.astype(jnp.bfloat16)
            lo = (r1 - mid.astype(jnp.float32)).astype(jnp.bfloat16)
            y = (jnp.dot(hi, sel, preferred_element_type=jnp.float32)
                 + jnp.dot(mid, sel, preferred_element_type=jnp.float32)
                 + jnp.dot(lo, sel, preferred_element_type=jnp.float32))

        y = y.astype(o_ref.dtype)
        for c in range(C):                             # C is tiny -> static unroll
            out_off = _aligned(c * hw_pad + j * _LANE)  # multiple of 128
            o_ref[:, pl.ds(out_off, _LANE)] = y[:, c * _LANE:(c + 1) * _LANE]

    if n_chunks <= 8:                                  # short: full static unroll
        for j in range(n_chunks):
            do_chunk(j)
    else:
        def body(j, carry):
            do_chunk(j)
            return carry
        lax.fori_loop(0, n_chunks, body, 0)


def _vmem_capacity_bytes():
    try:
        info = pltpu.get_tpu_info()
        cap = getattr(info, "vmem_capacity_bytes", None)
        if cap:
            return int(cap)
    except Exception:
        pass
    return 64 * 1024 * 1024          # conservative fallback (v7x-sized)


def simple_image_preprocess(x, out_dtype=jnp.float32):
    """Pallas equivalent of SimpleImagePreprocessor.forward.

    Args:
      x: [B, S, H, W, C] float32 in [0,1] or uint8 in [0,255].
      out_dtype: output dtype.  float32 matches the PyTorch module; bfloat16
        halves HBM write traffic (worth it on v5e) if the consumer allows it.
    Returns:
      [B, S*C, H, W] array of `out_dtype`.
    """
    if x.ndim != 5:
        raise ValueError(f"expected [B, S, H, W, C] input, got shape {x.shape}")
    B, S, H, W, C = x.shape
    if C > 16:
        raise ValueError("selection matrix is sized for image channel counts "
                         f"(C <= 16); got C={C}")

    input_is_uint8 = (x.dtype == jnp.uint8)
    if not input_is_uint8 and x.dtype != jnp.float32:
        x = x.astype(jnp.float32)

    N = B * S
    HW = H * W
    HWC = HW * C
    hw_pad = _round_up(HW, _LANE)
    row_pad = C * hw_pad                    # lane-dense padded row length
    n_chunks = hw_pad // _LANE
    n_pad = _round_up(N, _SUBLANE)

    # ---- lane-dense input slab: one frame per row, (h, w, c)-interleaved ----
    x_flat = x.reshape(N, HWC)              # metadata-only reshape
    if n_pad != N or row_pad != HWC:
        x_flat = jnp.pad(x_flat, ((0, n_pad - N), (0, row_pad - HWC)))

    # ---- chunk-local one-hot channel-selection matrix (values 0/1: exact) ---
    m = jnp.arange(_LANE * C)               # input lane within chunk : p*C + c
    k = jnp.arange(C * _LANE)               # output lane within chunk: c*128 + p
    sel = ((m[:, None] // C == k[None, :] % _LANE)
           & (m[:, None] % C == k[None, :] // _LANE)).astype(jnp.bfloat16)

    # ---- per-generation tile sizing ------------------------------------------
    cap = _vmem_capacity_bytes()
    # ~3/8 of physical VMEM as working-set budget (48 MiB on v5e/v6e's 128 MiB,
    # 24 MiB on v7x's 64 MiB); compile-time limit above it but below physical.
    budget = min(48 << 20, max(8 << 20, (cap * 3) // 8))
    vmem_limit = min((cap * 3) // 4, 96 << 20)

    in_itemsize = jnp.dtype(x_flat.dtype).itemsize
    out_itemsize = jnp.dtype(out_dtype).itemsize
    # Double-buffered in/out rows + small per-chunk matmul temporaries.
    per_frame = 2 * row_pad * (in_itemsize + out_itemsize) + 8 * _LANE * C * 4
    const_bytes = 2 * int(sel.size) * 2 + (2 << 20)     # sel buffers + slack

    min_need = _SUBLANE * per_frame + const_bytes
    if min_need > int(cap * 0.9):
        # TODO(synk): block the output lane dimension with a second grid axis
        # to support frames whose minimal 8-row tile exceeds physical VMEM.
        raise ValueError(
            f"frame too large for VMEM: minimum tile needs {min_need} bytes "
            f"but physical VMEM is {cap} bytes")
    vmem_limit = max(vmem_limit, min(int(cap * 0.9), min_need + (8 << 20)))

    max_f = max(_SUBLANE, (budget - const_bytes) // per_frame)

    # Frames per grid step: a multiple-of-8 divisor of n_pad that fits the
    # budget.  Keep >= 2 grid steps whenever there is enough work so the
    # single "parallel" axis can shard across v7x's two TensorCores.
    f_blk = _SUBLANE
    for d in range(_SUBLANE, n_pad + 1, _SUBLANE):
        if n_pad % d or d > max_f:
            continue
        if n_pad >= 2 * _SUBLANE and d > n_pad // 2:
            continue
        f_blk = d
    grid = (n_pad // f_blk,)

    kernel = functools.partial(
        _preprocess_kernel,
        n_channels=C, hw_pad=hw_pad, n_chunks=n_chunks,
        input_is_uint8=input_is_uint8)

    out2d = pl.pallas_call(
        kernel,
        out_shape=jax.ShapeDtypeStruct((n_pad, row_pad), out_dtype),
        grid_spec=pltpu.PrefetchScalarGridSpec(
            num_scalar_prefetch=0,
            grid=grid,
            in_specs=[
                pl.BlockSpec((f_blk, row_pad), lambda i: (i, 0)),
                pl.BlockSpec(sel.shape, lambda i: (0, 0)),
            ],
            out_specs=pl.BlockSpec((f_blk, row_pad), lambda i: (i, 0)),
        ),
        compiler_params=pltpu.CompilerParams(
            dimension_semantics=("parallel",),
            vmem_limit_bytes=int(vmem_limit),
        ),
    )(x_flat, sel)

    # (N, C, HW) -> (B, S*C, H, W): pure reshape; slice only if padding was used.
    out = out2d.reshape(n_pad, C, hw_pad)
    if n_pad != N or hw_pad != HW:
        out = out[:N, :, :HW]
    return out.reshape(B, S * C, H, W)


def _reference(x):
    if x.dtype == jnp.uint8:
        x = x.astype(jnp.float32) / 255.0
    B, S, H, W, C = x.shape
    return jnp.transpose(x, (0, 1, 4, 2, 3)).reshape(B, S * C, H, W)


if __name__ == "__main__":
    key = jax.random.PRNGKey(0)
    k1, k2 = jax.random.split(key)

    B, S, H, W, C = 2, 4, 16, 16, 3

    # float32 path (values in [0, 1]).
    x_f32 = jax.random.uniform(k1, (B, S, H, W, C), dtype=jnp.float32)
    out_f32 = jax.block_until_ready(simple_image_preprocess(x_f32))
    ref_f32 = _reference(x_f32)
    assert out_f32.shape == (B, S * C, H, W)
    assert out_f32.dtype == jnp.float32
    assert jnp.allclose(out_f32, ref_f32, atol=1e-6), "float32 path mismatch"

    # uint8 path (values in [0, 255]).
    x_u8 = jax.random.randint(
        k2, (B, S, H, W, C), 0, 256, dtype=jnp.int32).astype(jnp.uint8)
    out_u8 = jax.block_until_ready(simple_image_preprocess(x_u8))
    ref_u8 = _reference(x_u8)
    assert out_u8.shape == (B, S * C, H, W)
    assert out_u8.dtype == jnp.float32
    assert jnp.allclose(out_u8, ref_u8, atol=1e-6), "uint8 path mismatch"

    print("KERNEL_OK")
</pallas_src>

<mosaic_0001>
module attributes {stable_mosaic.version = 11 : i64} {
  func.func @_preprocess_kernel(%arg0: i32, %arg1: memref<8x768xf32, #tpu.memory_space<vmem>>, %arg2: memref<384x384xbf16, #tpu.memory_space<vmem>>, %arg3: memref<8x768xf32, #tpu.memory_space<vmem>>) attributes {dimension_semantics = [#tpu.dimension_semantics<parallel>], iteration_bounds = array<i64: 1>, scalar_prefetch = 0 : i64, scratch_operands = 0 : i64, tpu.core_type = #tpu.core_type<tc>, window_params = [{transform_indices = @transform_0, window_bounds = array<i64: 8, 768>}, {pipeline_mode = #tpu.pipeline_mode<synchronous>, transform_indices = @transform_1, window_bounds = array<i64: 384, 384>}, {transform_indices = @transform_2, window_bounds = array<i64: 8, 768>}]} {
    %c0 = arith.constant 0 : index
    %c0_0 = arith.constant 0 : index
    %0 = vector.load %arg2[%c0, %c0_0] : memref<384x384xbf16, #tpu.memory_space<vmem>>, vector<384x384xbf16>
    %c0_1 = arith.constant 0 : index
    %c0_2 = arith.constant 0 : index
    %1 = vector.load %arg1[%c0_1, %c0_2] : memref<8x768xf32, #tpu.memory_space<vmem>>, vector<8x384xf32>
    %2 = arith.truncf %1 : vector<8x384xf32> to vector<8x384xbf16>
    %3 = arith.extf %2 : vector<8x384xbf16> to vector<8x384xf32>
    %4 = arith.subf %1, %3 : vector<8x384xf32>
    %5 = arith.truncf %4 : vector<8x384xf32> to vector<8x384xbf16>
    %6 = arith.extf %5 : vector<8x384xbf16> to vector<8x384xf32>
    %7 = arith.subf %4, %6 : vector<8x384xf32>
    %8 = arith.truncf %7 : vector<8x384xf32> to vector<8x384xbf16>
    %cst = arith.constant dense<0.000000e+00> : vector<8x384xf32>
    %9 = tpu.matmul %2, %0, %cst {dimension_numbers = #tpu.dot_dimension_numbers<[1], [0], [0], [1], [0, 0, 1, 1], [], []>} : vector<8x384xbf16>, vector<384x384xbf16>, vector<8x384xf32> -> vector<8x384xf32>
    %cst_3 = arith.constant dense<0.000000e+00> : vector<8x384xf32>
    %10 = tpu.matmul %5, %0, %cst_3 {dimension_numbers = #tpu.dot_dimension_numbers<[1], [0], [0], [1], [0, 0, 1, 1], [], []>} : vector<8x384xbf16>, vector<384x384xbf16>, vector<8x384xf32> -> vector<8x384xf32>
    %11 = arith.addf %9, %10 : vector<8x384xf32>
    %cst_4 = arith.constant dense<0.000000e+00> : vector<8x384xf32>
    %12 = tpu.matmul %8, %0, %cst_4 {dimension_numbers = #tpu.dot_dimension_numbers<[1], [0], [0], [1], [0, 0, 1, 1], [], []>} : vector<8x384xbf16>, vector<384x384xbf16>, vector<8x384xf32> -> vector<8x384xf32>
    %13 = arith.addf %11, %12 : vector<8x384xf32>
    %14 = vector.extract_strided_slice %13 {offsets = [0, 0], sizes = [8, 128], strides = [1, 1]} : vector<8x384xf32> to vector<8x128xf32>
    %c0_5 = arith.constant 0 : index
    %c0_6 = arith.constant 0 : index
    %15 = vector.load %arg3[%c0_5, %c0_6] : memref<8x768xf32, #tpu.memory_space<vmem>>, vector<8x128xf32>
    tpu.vector_store %arg3[%c0_5, %c0_6], %14 {strides = array<i32>} : memref<8x768xf32, #tpu.memory_space<vmem>>, vector<8x128xf32>,
    %16 = vector.extract_strided_slice %13 {offsets = [0, 128], sizes = [8, 128], strides = [1, 1]} : vector<8x384xf32> to vector<8x128xf32>
    %c0_7 = arith.constant 0 : index
    %c256 = arith.constant 256 : index
    %17 = vector.load %arg3[%c0_7, %c256] : memref<8x768xf32, #tpu.memory_space<vmem>>, vector<8x128xf32>
    tpu.vector_store %arg3[%c0_7, %c256], %16 {strides = array<i32>} : memref<8x768xf32, #tpu.memory_space<vmem>>, vector<8x128xf32>,
    %18 = vector.extract_strided_slice %13 {offsets = [0, 256], sizes = [8, 128], strides = [1, 1]} : vector<8x384xf32> to vector<8x128xf32>
    %c0_8 = arith.constant 0 : index
    %c512 = arith.constant 512 : index
    %19 = vector.load %arg3[%c0_8, %c512] : memref<8x768xf32, #tpu.memory_space<vmem>>, vector<8x128xf32>
    tpu.vector_store %arg3[%c0_8, %c512], %18 {strides = array<i32>} : memref<8x768xf32, #tpu.memory_space<vmem>>, vector<8x128xf32>,
    %c0_9 = arith.constant 0 : index
    %c384 = arith.constant 384 : index
    %20 = vector.load %arg1[%c0_9, %c384] : memref<8x768xf32, #tpu.memory_space<vmem>>, vector<8x384xf32>
    %21 = arith.truncf %20 : vector<8x384xf32> to vector<8x384xbf16>
    %22 = arith.extf %21 : vector<8x384xbf16> to vector<8x384xf32>
    %23 = arith.subf %20, %22 : vector<8x384xf32>
    %24 = arith.truncf %23 : vector<8x384xf32> to vector<8x384xbf16>
    %25 = arith.extf %24 : vector<8x384xbf16> to vector<8x384xf32>
    %26 = arith.subf %23, %25 : vector<8x384xf32>
    %27 = arith.truncf %26 : vector<8x384xf32> to vector<8x384xbf16>
    %cst_10 = arith.constant dense<0.000000e+00> : vector<8x384xf32>
    %28 = tpu.matmul %21, %0, %cst_10 {dimension_numbers = #tpu.dot_dimension_numbers<[1], [0], [0], [1], [0, 0, 1, 1], [], []>} : vector<8x384xbf16>, vector<384x384xbf16>, vector<8x384xf32> -> vector<8x384xf32>
    %cst_11 = arith.constant dense<0.000000e+00> : vector<8x384xf32>
    %29 = tpu.matmul %24, %0, %cst_11 {dimension_numbers = #tpu.dot_dimension_numbers<[1], [0], [0], [1], [0, 0, 1, 1], [], []>} : vector<8x384xbf16>, vector<384x384xbf16>, vector<8x384xf32> -> vector<8x384xf32>
    %30 = arith.addf %28, %29 : vector<8x384xf32>
    %cst_12 = arith.constant dense<0.000000e+00> : vector<8x384xf32>
    %31 = tpu.matmul %27, %0, %cst_12 {dimension_numbers = #tpu.dot_dimension_numbers<[1], [0], [0], [1], [0, 0, 1, 1], [], []>} : vector<8x384xbf16>, vector<384x384xbf16>, vector<8x384xf32> -> vector<8x384xf32>
    %32 = arith.addf %30, %31 : vector<8x384xf32>
    %33 = vector.extract_strided_slice %32 {offsets = [0, 0], sizes = [8, 128], strides = [1, 1]} : vector<8x384xf32> to vector<8x128xf32>
    %c0_13 = arith.constant 0 : index
    %c128 = arith.constant 128 : index
    %34 = vector.load %arg3[%c0_13, %c128] : memref<8x768xf32, #tpu.memory_space<vmem>>, vector<8x128xf32>
    tpu.vector_store %arg3[%c0_13, %c128], %33 {strides = array<i32>} : memref<8x768xf32, #tpu.memory_space<vmem>>, vector<8x128xf32>,
    %35 = vector.extract_strided_slice %32 {offsets = [0, 128], sizes = [8, 128], strides = [1, 1]} : vector<8x384xf32> to vector<8x128xf32>
    %c0_14 = arith.constant 0 : index
    %c384_15 = arith.constant 384 : index
    %36 = vector.load %arg3[%c0_14, %c384_15] : memref<8x768xf32, #tpu.memory_space<vmem>>, vector<8x128xf32>
    tpu.vector_store %arg3[%c0_14, %c384_15], %35 {strides = array<i32>} : memref<8x768xf32, #tpu.memory_space<vmem>>, vector<8x128xf32>,
    %37 = vector.extract_strided_slice %32 {offsets = [0, 256], sizes = [8, 128], strides = [1, 1]} : vector<8x384xf32> to vector<8x128xf32>
    %c0_16 = arith.constant 0 : index
    %c640 = arith.constant 640 : index
    %38 = vector.load %arg3[%c0_16, %c640] : memref<8x768xf32, #tpu.memory_space<vmem>>, vector<8x128xf32>
    tpu.vector_store %arg3[%c0_16, %c640], %37 {strides = array<i32>} : memref<8x768xf32, #tpu.memory_space<vmem>>, vector<8x128xf32>,
    return
  }
  func.func @transform_0(%arg0: i32) -> (i32, i32) {
    %c0_i32 = arith.constant 0 : i32
    %c0_i32_0 = arith.constant 0 : i32
    return %arg0, %c0_i32 : i32, i32
  }
  func.func @transform_1(%arg0: i32) -> (i32, i32) {
    %c0_i32 = arith.constant 0 : i32
    %c0_i32_0 = arith.constant 0 : i32
    %c0_i32_1 = arith.constant 0 : i32
    return %c0_i32, %c0_i32_0 : i32, i32
  }
  func.func @transform_2(%arg0: i32) -> (i32, i32) {
    %c0_i32 = arith.constant 0 : i32
    %c0_i32_0 = arith.constant 0 : i32
    return %arg0, %c0_i32 : i32, i32
  }
}

</mosaic_0001>

<bundles_post_ra>
// kernel: tpu_custom_call.1
= control target key start
LH: loop header
LB: loop body
LE: loop exit
PB: predicated region body
PF: predicated region fallthrough
CT: control target
= control target key end

     0   :  { %7 = vsyncpa [#allocation3], 0  ;;  %s3019_s0 = inlined_call_operand.hbm [shape: f32[8,768], index: 0, kind: input, shape index: {}]   ;;  %s3020_s1 = inlined_call_operand.hbm [shape: bf16[384,384], index: 1, kind: input, shape index: {}]   ;;  %s3021_s2 = inlined_call_operand.hbm [shape: f32[8,768], index: 2, kind: output, shape index: {}]  }
   0x1   :  { %8 = vsyncpa [#allocation6], 0 }
   0x2   :  { %9 = vsyncpa [#allocation4], 0  ;;  %s2187_s9 = smov [#allocation2]   ;;  %s2188_s11 = smov [#allocation5]  }
   0x3   :  { %s16_s10 = sshll.u32 %s2187_s9, 4  ;;  %s25_s12 = sshll.u32 %s2188_s11, 4  ;;  %s17_s10 = int_to_ptr.vmem [resolvable:$true] %s16_s10  ;;  %s26_s12 = int_to_ptr.vmem [resolvable:$true] %s25_s12 }
   0x4   :  { %s2129_s13 = scalar_lea.vmem %s17_s10, 768  ;;  %p2134_p1 = scmp.lt.s32.totalorder %s17_s10, %s17_s10 }
   0x5   :  { %p2130_p0 = scmp.ne.s32.totalorder %s17_s10, %s2129_s13  ;;  %p2135_p2 = scmp.lt.s32.totalorder %s2129_s13, %s2129_s13 }
   0x7   :  { %p2136_p3 = por %p2135_p2, %p2134_p1 }
   0x9   :  { %p2137_p4 = pnand %p2136_p3, %p2130_p0 }
   0xb   :  { %2140 = shalt.err (!%p2137_p4)
}
   0xc   :  { %19 = dma.hbm_to_vmem [thread:$0]  %s3019_s0, 768, %s17_s10, [#allocation3]  }
   0xd   :  { %s2149_s16 = scalar_lea.vmem %s26_s12, 9216  ;;  %p2154_p6 = scmp.lt.s32.totalorder %s26_s12, %s26_s12 }
   0xe   :  { %p2150_p5 = scmp.ne.s32.totalorder %s26_s12, %s2149_s16  ;;  %p2155_p7 = scmp.lt.s32.totalorder %s2149_s16, %s2149_s16 }
  0x10   :  { %p2156_p8 = por %p2155_p7, %p2154_p6 }
  0x12   :  { %p2157_p9 = pnand %p2156_p8, %p2150_p5 }
  0x14   :  { %2160 = shalt.err (!%p2157_p9)
}
  0x15   :  { %s2189_s17 = smov 192   ;;  %s2190_s18 = smov 12  }
  0x16   :  { %31 = dma.hbm_to_vmem [thread:$0]  %s3020_s1, 9216, %s26_s12, [#allocation6], %s2189_s17, %s2189_s17, %s2190_s18  }
  0x17   :  { %2181 = dma.done.wait [#allocation3], 768  }
  0x18   :  { %2182 = vsyncadd [#allocation3], 4294966528 }
  0x19   :  { %2183 = dma.done.wait [#allocation6], 9216  }
  0x1a   :  { %2184 = vsyncadd [#allocation6], 4294958080  ;;  %v3022_v0 = vmov 0   ;;  %v2217_v1 = vld [vmem:[#allocation5 + $0xac] ss:$12 sps:$4 sm:$0xff]   ;;  %v137_v27 = vld [vmem:[#allocation2 + $0x10] sm:$0xff] }
  0x1b   :  { %616 = vmatprep.mubr.bf16.mxu1 %v3022_v0  ;;  %3128 = vst [vmem:[#allocation11_spill] sm:$0xff] %v2217_v1  ;;  %v2219_v2 = vld [vmem:[#allocation5 + $0x22c] ss:$12 sps:$4 sm:$0xff]   ;;  %543 = vmatprep.subr.bf16.mxu0 %v2217_v1  ;;  %v2222_v3 = vld [vmem:[#allocation5 + $0xa8] ss:$12 sps:$4 sm:$0xff]   ;;  %v2295_v30 = vpack.c.bf16 %v137_v27, %v137_v27  ;;  %vm2193_vm0 = vmmov 0  }
  0x1c   :  { %v2224_v4 = vld [vmem:[#allocation5 + $0x228] ss:$12 sps:$4 sm:$0xff]   ;;  %584 = vmatprep.subr.bf16.mxu1 %v2219_v2  ;;  %544 = vmatpush1.bf16.msra.mxu0 %v2222_v3  ;;  %v2233_v7 = vld [vmem:[#allocation5 + $0x90] ss:$12 sps:$4 sm:$0xff]   ;;  %v2243_v11 = vld [vmem:[#allocation5 + $0x78] ss:$12 sps:$4 sm:$0xff]  }
  0x1d   :  { %v2227_v5 = vld [vmem:[#allocation5 + $0x94] ss:$12 sps:$4 sm:$0xff]   ;;  %585 = vmatpush1.bf16.msra.mxu1 %v2224_v4  ;;  %3131 = vst [vmem:[#allocation14_spill] sm:$0xff] %v2233_v7  ;;  %v2236_v8 = vld [vmem:[#allocation5 + $0x210] ss:$12 sps:$4 sm:$0xff]   ;;  %3134 = vst [vmem:[#allocation17_spill] sm:$0xff] %v2243_v11  ;;  %v143_v33 = vunpack.c.l.bf16 %v2295_v30 }
  0x1e   :  { %3129 = vst [vmem:[#allocation12_spill] sm:$0xff] %v2227_v5  ;;  %v2231_v6 = vld [vmem:[#allocation5 + $0x214] ss:$12 sps:$4 sm:$0xff]   ;;  %545 = vmatprep.subr.bf16.mxu0 %v2227_v5  ;;  %3132 = vst [vmem:[#allocation15_spill] sm:$0xff] %v2236_v8  ;;  %v2239_v9 = vld [vmem:[#allocation5 + $0x7c] ss:$12 sps:$4 sm:$0xff]  }
  0x1f   :  { %3130 = vst [vmem:[#allocation13_spill] sm:$0xff] %v2231_v6  ;;  %586 = vmatprep.subr.bf16.mxu1 %v2231_v6  ;;  %v2241_v10 = vld [vmem:[#allocation5 + $0x1fc] ss:$12 sps:$4 sm:$0xff]   ;;  %v2245_v12 = vld [vmem:[#allocation5 + $0x1f8] ss:$12 sps:$4 sm:$0xff]   ;;  %v2310_v36 = vsub.f32 %v137_v27, %v143_v33  ;;  %v135_v60 = vld [vmem:[#allocation2] sm:$0xff] }
  0x20   :  { %3133 = vst [vmem:[#allocation16_spill] sm:$0xff] %v2241_v10  ;;  %3135 = vst [vmem:[#allocation18_spill] sm:$0xff] %v2245_v12  ;;  %546 = vmatpush1.bf16.msra.mxu0 %v2233_v7  ;;  %v2249_v13 = vld [vmem:[#allocation5 + $0x64] ss:$12 sps:$4 sm:$0xff]   ;;  %v2255_v15 = vld [vmem:[#allocation5 + $0x60] ss:$12 sps:$4 sm:$0xff]   ;;  %v2392_v0 = vpack.c.bf16 %v135_v60, %v135_v60 }
  0x21   :  { %587 = vmatpush1.bf16.msra.mxu1 %v2236_v8  ;;  %3136 = vst [vmem:[#allocation19_spill] sm:$0xff] %v2249_v13  ;;  %547 = vmatprep.subr.bf16.mxu0 %v2239_v9  ;;  %v2253_v14 = vld [vmem:[#allocation5 + $0x1e4] ss:$12 sps:$4 sm:$0xff]   ;;  %3137 = vst [vmem:[#allocation20_spill] sm:$0xff] %v2255_v15  ;;  %v2259_v16 = vld [vmem:[#allocation5 + $0x1e0] ss:$12 sps:$4 sm:$0xff]   ;;  %v2322_v39 = vpack.c.bf16 %v2310_v36, %v2310_v36 }
  0x22   :  { %588 = vmatprep.subr.bf16.mxu1 %v2241_v10  ;;  %3138 = vst [vmem:[#allocation21_spill] sm:$0xff] %v2259_v16  ;;  %v2261_v17 = vld [vmem:[#allocation5 + $0x4c] ss:$12 sps:$4 sm:$0xff]   ;;  %v2267_v19 = vld [vmem:[#allocation5 + $0x48] ss:$12 sps:$4 sm:$0xff]   ;;  %3145 = vst [vmem:[#allocation28_spill] sm:$0xff] %v2310_v36 }
  0x23   :  { %3139 = vst [vmem:[#allocation22_spill] sm:$0xff] %v2261_v17  ;;  %v2265_v18 = vld [vmem:[#allocation5 + $0x1cc] ss:$12 sps:$4 sm:$0xff]   ;;  %3141 = vst [vmem:[#allocation24_spill] sm:$0xff] %v2267_v19  ;;  %v2269_v20 = vld [vmem:[#allocation5 + $0x1c8] ss:$12 sps:$4 sm:$0xff]  }
  0x24   :  { %548 = vmatpush1.bf16.msra.mxu0 %v2243_v11  ;;  %3140 = vst [vmem:[#allocation23_spill] sm:$0xff] %v2265_v18  ;;  %v2273_v21 = vld [vmem:[#allocation5 + $0x34] ss:$12 sps:$4 sm:$0xff]   ;;  %v2279_v23 = vld [vmem:[#allocation5 + $0x30] ss:$12 sps:$4 sm:$0xff]   ;;  %s2194_s0 = smov [#allocation7]  }
  0x25   :  { %589 = vmatpush1.bf16.msra.mxu1 %v2245_v12  ;;  %549 = vmatprep.subr.bf16.mxu0 %v2249_v13  ;;  %3142 = vst [vmem:[#allocation25_spill] sm:$0xff] %v2273_v21  ;;  %v2277_v22 = vld [vmem:[#allocation5 + $0x1b4] ss:$12 sps:$4 sm:$0xff]   ;;  %3144 = vst [vmem:[#allocation27_spill] sm:$0xff] %v2279_v23  ;;  %v2283_v24 = vld [vmem:[#allocation5 + $0x1b0] ss:$12 sps:$4 sm:$0xff]  }
  0x26   :  { %590 = vmatprep.subr.bf16.mxu1 %v2253_v14  ;;  %3143 = vst [vmem:[#allocation26_spill] sm:$0xff] %v2277_v22  ;;  %v2285_v25 = vld [vmem:[#allocation5 + $0x1c] ss:$12 sps:$4 sm:$0xff]   ;;  %v2291_v28 = vld [vmem:[#allocation5 + $0x18] ss:$12 sps:$4 sm:$0xff]   ;;  %s1557_s1 = sshll.u32 %s2194_s0, 4  ;;  %s1558_s1 = int_to_ptr.vmem [resolvable:$true] %s1557_s1 }
  0x27   :  { %v2289_v26 = vld [vmem:[#allocation5 + $0x19c] ss:$12 sps:$4 sm:$0xff]   ;;  %v2293_v29 = vld [vmem:[#allocation5 + $0x198] ss:$12 sps:$4 sm:$0xff]   ;;  %v2306_v34 = vld [vmem:[#allocation5] ss:$12 sps:$4 sm:$0xff]   ;;  %p2166_p11 = scmp.lt.s32.totalorder %s1558_s1, %s1558_s1 }
  0x28   :  { %550 = vmatpush1.bf16.msra.mxu0 %v2255_v15  ;;  %v2299_v31 = vld [vmem:[#allocation5 + $0x4] ss:$12 sps:$4 sm:$0xff]   ;;  %v2308_v35 = vld [vmem:[#allocation5 + $0x180] ss:$12 sps:$4 sm:$0xff]   ;;  %v2324_v40 = vld [vmem:[#allocation5 + $0x168] ss:$12 sps:$4 sm:$0xff]  }
  0x29   :  { %591 = vmatpush1.bf16.msra.mxu1 %v2259_v16  ;;  %551 = vmatprep.subr.bf16.mxu0 %v2261_v17  ;;  %v2303_v32 = vld [vmem:[#allocation5 + $0x184] ss:$12 sps:$4 sm:$0xff]   ;;  %v2314_v37 = vld [vmem:[#allocation5 + $0x16c] ss:$12 sps:$4 sm:$0xff]   ;;  %v2332_v42 = vld [vmem:[#allocation5 + $0x154] ss:$12 sps:$4 sm:$0xff]  }
  0x2a   :  { %592 = vmatprep.subr.bf16.mxu1 %v2265_v18  ;;  %v2318_v38 = vld [vmem:[#allocation5 + $0x170] ss:$12 sps:$4 sm:$0xff]   ;;  %v2334_v43 = vld [vmem:[#allocation5 + $0x158] ss:$12 sps:$4 sm:$0xff]   ;;  %v2347_v47 = vld [vmem:[#allocation5 + $0x140] ss:$12 sps:$4 sm:$0xff]  }
  0x2b   :  { %v2328_v41 = vld [vmem:[#allocation5 + $0xb0] ss:$12 sps:$4 sm:$0xff]   ;;  %3146 = vst [vmem:[#allocation29_spill] sm:$0xff] %v2334_v43  ;;  %v2339_v45 = vld [vmem:[#allocation5 + $0x98] ss:$12 sps:$4 sm:$0xff]   ;;  %3148 = vst [vmem:[#allocation31_spill] sm:$0xff] %v2347_v47 }
  0x2c   :  { %552 = vmatpush1.bf16.msra.mxu0 %v2267_v19  ;;  %v2336_v44 = vld [vmem:[#allocation5 + $0x150] ss:$12 sps:$4 sm:$0xff]   ;;  %3147 = vst [vmem:[#allocation30_spill] sm:$0xff] %v2339_v45  ;;  %v2349_v48 = vld [vmem:[#allocation5 + $0x138] ss:$12 sps:$4 sm:$0xff]   ;;  %s2161_s21 = scalar_lea.vmem %s1558_s1, 768 }
  0x2d   :  { %593 = vmatpush1.bf16.msra.mxu1 %v2269_v20  ;;  %553 = vmatprep.subr.bf16.mxu0 %v2273_v21  ;;  %v2343_v46 = vld [vmem:[#allocation5 + $0x13c] ss:$12 sps:$4 sm:$0xff]   ;;  %v2353_v49 = vld [vmem:[#allocation5 + $0x80] ss:$12 sps:$4 sm:$0xff]   ;;  %v2355_v50 = vld [vmem:[#allocation5 + $0x124] ss:$12 sps:$4 sm:$0xff]   ;;  %p2162_p10 = scmp.ne.s32.totalorder %s1558_s1, %s2161_s21  ;;  %p2167_p12 = scmp.lt.s32.totalorder %s2161_s21, %s2161_s21 }
  0x2e   :  { %594 = vmatprep.subr.bf16.mxu1 %v2277_v22  ;;  %3149 = vst [vmem:[#allocation32_spill] sm:$0xff] %v2353_v49  ;;  %v2359_v51 = vld [vmem:[#allocation5 + $0x128] ss:$12 sps:$4 sm:$0xff]   ;;  %v2361_v52 = vld [vmem:[#allocation5 + $0x120] ss:$12 sps:$4 sm:$0xff]   ;;  %v136_v59 = vld [vmem:[#allocation2 + $0x8] sm:$0xff] }
  0x2f   :  { %3150 = vst [vmem:[#allocation33_spill] sm:$0xff] %v2359_v51  ;;  %v2363_v53 = vld [vmem:[#allocation5 + $0x68] ss:$12 sps:$4 sm:$0xff]   ;;  %v2367_v54 = vld [vmem:[#allocation5 + $0x10c] ss:$12 sps:$4 sm:$0xff]   ;;  %v2385_v62 = vpack.c.bf16 %v136_v59, %v136_v59  ;;  %p2168_p13 = por %p2167_p12, %p2166_p11 }
  0x30   :  { %554 = vmatpush1.bf16.msra.mxu0 %v2279_v23  ;;  %3151 = vst [vmem:[#allocation34_spill] sm:$0xff] %v2363_v53  ;;  %v2371_v55 = vld [vmem:[#allocation5 + $0x110] ss:$12 sps:$4 sm:$0xff]   ;;  %v2373_v56 = vld [vmem:[#allocation5 + $0x108] ss:$12 sps:$4 sm:$0xff]  }
  0x31   :  { %595 = vmatpush1.bf16.msra.mxu1 %v2283_v24  ;;  %555 = vmatprep.subr.bf16.mxu0 %v2285_v25  ;;  %3152 = vst [vmem:[#allocation35_spill] sm:$0xff] %v2371_v55  ;;  %v2375_v57 = vld [vmem:[#allocation5 + $0x50] ss:$12 sps:$4 sm:$0xff]   ;;  %v2379_v58 = vld [vmem:[#allocation5 + $0xf4] ss:$12 sps:$4 sm:$0xff]   ;;  %v142_v33 = vunpack.c.l.bf16 %v2385_v62  ;;  %p2169_p0 = pnand %p2168_p13, %p2162_p10 }
  0x32   :  { %596 = vmatprep.subr.bf16.mxu1 %v2289_v26  ;;  %3153 = vst [vmem:[#allocation36_spill] sm:$0xff] %v2375_v57  ;;  %v2383_v61 = vld [vmem:[#allocation5 + $0xf8] ss:$12 sps:$4 sm:$0xff]   ;;  %v2387_v63 = vld [vmem:[#allocation5 + $0xf0] ss:$12 sps:$4 sm:$0xff]  }
  0x33   :  { %3154 = vst [vmem:[#allocation37_spill] sm:$0xff] %v2383_v61  ;;  %v2389_v27 = vld [vmem:[#allocation5 + $0x38] ss:$12 sps:$4 sm:$0xff]   ;;  %v2396_v36 = vld [vmem:[#allocation5 + $0xdc] ss:$12 sps:$4 sm:$0xff]  }
  0x34   :  { %556 = vmatpush1.bf16.msra.mxu0 %v2291_v28  ;;  %3155 = vst [vmem:[#allocation38_spill] sm:$0xff] %v2389_v27 }
  0x35   :  { %597 = vmatpush1.bf16.msra.mxu1 %v2293_v29  ;;  %557 = vmatprep.subr.bf16.mxu0 %v2299_v31 }
  0x36   :  { %598 = vmatprep.subr.bf16.mxu1 %v2303_v32 }
  0x38   :  { %558 = vmatpush1.bf16.msra.mxu0 %v2306_v34 }
  0x39   :  { %599 = vmatpush1.bf16.msra.mxu1 %v2308_v35  ;;  %559 = vmatprep.subr.bf16.mxu0 %v2314_v37 }
  0x3a   :  { %1639 = vmatprep.subr.bf16.mxu1 %v2318_v38 }
  0x3c   :  { %617 = vmatmul.mubr.bf16.vlgmr.msra.gmra.mxu1 %v2322_v39  ;;  %560 = vmatpush2.bf16.msra.mxu0 %v2324_v40 }
  0x3d   :  { %1640 = vmatpush3.bf16.msra.mxu1 %v2328_v41  ;;  %561 = vmatprep.subr.bf16.mxu0 %v2332_v42 }
  0x3e   :  { %1641 = vmatprep.subr.bf16.mxu1 %v2334_v43  ;;  %v2433_v43 = vld [vmem:[#allocation5 + $0x230] ss:$12 sps:$4 sm:$0xff]  }
  0x3f   :  { %3159 = vst [vmem:[#allocation42_spill] sm:$0xff] %v2433_v43 }
  0x40   :  { %562 = vmatpush2.bf16.msra.mxu0 %v2336_v44 }
  0x41   :  { %1642 = vmatpush3.bf16.msra.mxu1 %v2339_v45  ;;  %563 = vmatprep.subr.bf16.mxu0 %v2343_v46  ;;  %v2427_v45 = vld [vmem:[#allocation5 + $0x8] ss:$12 sps:$4 sm:$0xff]  }
  0x42   :  { %1643 = vmatprep.subr.bf16.mxu1 %v2347_v47  ;;  %v141_v47 = vunpack.c.l.bf16 %v2392_v0 }
  0x44   :  { %564 = vmatpush2.bf16.msra.mxu0 %v2349_v48 }
  0x45   :  { %1644 = vmatpush3.bf16.msra.mxu1 %v2353_v49  ;;  %565 = vmatprep.subr.bf16.mxu0 %v2355_v50 }
  0x46   :  { %1645 = vmatprep.subr.bf16.mxu1 %v2359_v51  ;;  %v2404_v51 = vld [vmem:[#allocation5 + $0xd8] ss:$12 sps:$4 sm:$0xff]  }
  0x48   :  { %566 = vmatpush2.bf16.msra.mxu0 %v2361_v52 }
  0x49   :  { %1646 = vmatpush3.bf16.msra.mxu1 %v2363_v53  ;;  %567 = vmatprep.subr.bf16.mxu0 %v2367_v54  ;;  %v2402_v53 = vsub.f32 %v136_v59, %v142_v33  ;;  %v2417_v59 = vld [vmem:[#allocation5 + $0xc4] ss:$12 sps:$4 sm:$0xff]   ;;  %v2419_v33 = vld [vmem:[#allocation5 + $0xc8] ss:$12 sps:$4 sm:$0xff]  }
  0x4a   :  { %1647 = vmatprep.subr.bf16.mxu1 %v2371_v55  ;;  %v2400_v55 = vld [vmem:[#allocation5 + $0xe0] ss:$12 sps:$4 sm:$0xff]  }
  0x4b   :  { %3156 = vst [vmem:[#allocation39_spill] sm:$0xff] %v2400_v55  ;;  %v2408_v49 = vpack.c.bf16 %v2402_v53, %v2402_v53 }
  0x4c   :  { %568 = vmatpush2.bf16.msra.mxu0 %v2373_v56 }
  0x4d   :  { %1648 = vmatpush3.bf16.msra.mxu1 %v2375_v57  ;;  %569 = vmatprep.subr.bf16.mxu0 %v2379_v58  ;;  %v2413_v57 = vld [vmem:[#allocation5 + $0x20] ss:$12 sps:$4 sm:$0xff]  }
  0x4e   :  { %1649 = vmatprep.subr.bf16.mxu1 %v2383_v61  ;;  %3157 = vst [vmem:[#allocation40_spill] sm:$0xff] %v2413_v57  ;;  %575 = vmatprep.mubr.bf16.mxu0 %v2408_v49  ;;  %v144_v61 = vsub.f32 %v135_v60, %v141_v47  ;;  %v3079_v47 = vmov 0.0   ;;  %v2439_v60 = vld [vmem:[#allocation5 + $0x218] ss:$12 sps:$4 sm:$0xff]  }
  0x4f   :  { %657 = vmatprep.mubr.bf16.mxu1 %v2408_v49  ;;  %3160 = vst [vmem:[#allocation43_spill] sm:$0xff] %v2439_v60 }
  0x50   :  { %570 = vmatpush2.bf16.msra.mxu0 %v2387_v63 }
  0x51   :  { %1650 = vmatpush3.bf16.msra.mxu1 %v2389_v27  ;;  %571 = vmatprep.subr.bf16.mxu0 %v2396_v36  ;;  %v2425_v27 = vld [vmem:[#allocation5 + $0xc0] ss:$12 sps:$4 sm:$0xff]  }
  0x52   :  { %1651 = vmatprep.subr.bf16.mxu1 %v2400_v55  ;;  %3158 = vst [vmem:[#allocation41_spill] sm:$0xff] %v2425_v27  ;;  %v147_v55 = vpack.c.bf16 %v144_v61, %v144_v61 }
  0x54   :  { %572 = vmatpush2.bf16.msra.mxu0 %v2404_v51 }
  0x55   :  { %1652 = vmatpush3.bf16.msra.mxu1 %v2413_v57  ;;  %573 = vmatprep.subr.bf16.mxu0 %v2417_v59 }
  0x56   :  { %1653 = vmatprep.subr.bf16.mxu1 %v2419_v33 }
  0x58   :  { %574 = vmatpush2.bf16.msra.mxu0 %v2425_v27 }
  0x59   :  { %1654 = vmatpush3.bf16.msra.mxu1 %v2427_v45  ;;  %1825 = vmatprep.subr.bf16.mxu0 %v3079_v47 }
  0x5a   :  { %705 = vmatprep.subr.bf16.mxu1 %v2217_v1  ;;  %v2448_v1 = vld [vmem:[#allocation5 + $0x200] ss:$12 sps:$4 sm:$0xff]  }
  0x5b   :  { %576 = vmatmul.mubr.bf16.vlgmr.msra.gmra.mxu0 %v147_v55  ;;  %3161 = vst [vmem:[#allocation44_spill] sm:$0xff] %v2448_v1 }
  0x5c   :  { %658 = vmatmul.mubr.bf16.vlgmr.msra.gmra.mxu1 %v147_v55  ;;  %1826 = vmatpush3.bf16.msra.mxu0 %v2433_v43 }
  0x5d   :  { %706 = vmatpush1.bf16.msra.mxu1 %v2222_v3  ;;  %1827 = vmatprep.subr.bf16.mxu0 %v3079_v47 }
  0x5e   :  { %707 = vmatprep.subr.bf16.mxu1 %v2227_v5  ;;  %1841 = vmatprep.mubr.msk.bf16.mxu0 %vm2193_vm0, %v3079_v47  ;;  %v2454_v5 = vld [vmem:[#allocation5 + $0x1e8] ss:$12 sps:$4 sm:$0xff]  }
  0x5f   :  { %737 = vmatprep.mubr.bf16.mxu1 %v2385_v62 }
  0x60   :  { %1828 = vmatpush3.bf16.msra.mxu0 %v2439_v60 }
  0x61   :  { %708 = vmatpush1.bf16.msra.mxu1 %v2233_v7  ;;  %1829 = vmatprep.subr.bf16.mxu0 %v3079_v47  ;;  %v2460_v7 = vld [vmem:[#allocation5 + $0x1d0] ss:$12 sps:$4 sm:$0xff]  }
  0x62   :  { %709 = vmatprep.subr.bf16.mxu1 %v2239_v9  ;;  %3162 = vst [vmem:[#allocation45_spill] sm:$0xff] %v2460_v7 }
  0x64   :  { %1830 = vmatpush3.bf16.msra.mxu0 %v2448_v1 }
  0x65   :  { %710 = vmatpush1.bf16.msra.mxu1 %v2243_v11  ;;  %1831 = vmatprep.subr.bf16.mxu0 %v3079_v47  ;;  %v2466_v11 = vld [vmem:[#allocation5 + $0x1b8] ss:$12 sps:$4 sm:$0xff]  }
  0x66   :  { %711 = vmatprep.subr.bf16.mxu1 %v2249_v13  ;;  %3163 = vst [vmem:[#allocation46_spill] sm:$0xff] %v2466_v11  ;;  %v151_v13 = vunpack.c.l.bf16 %v2408_v49  ;;  %v3169_v49 = vld [vmem:[#allocation30_spill] sm:$0xff] }
  0x68   :  { %1832 = vmatpush3.bf16.msra.mxu0 %v2454_v5 }
  0x69   :  { %712 = vmatpush1.bf16.msra.mxu1 %v2255_v15  ;;  %1833 = vmatprep.subr.bf16.mxu0 %v3079_v47  ;;  %v2472_v15 = vld [vmem:[#allocation5 + $0x1a0] ss:$12 sps:$4 sm:$0xff]  }
  0x6a   :  { %713 = vmatprep.subr.bf16.mxu1 %v2261_v17  ;;  %3164 = vst [vmem:[#allocation47_spill] sm:$0xff] %v2472_v15  ;;  %v150_v17 = vunpack.c.l.bf16 %v147_v55  ;;  %v3171_v55 = vld [vmem:[#allocation32_spill] sm:$0xff] }
  0x6c   :  { %1834 = vmatpush3.bf16.msra.mxu0 %v2460_v7 }
  0x6d   :  { %714 = vmatpush1.bf16.msra.mxu1 %v2267_v19  ;;  %1835 = vmatprep.subr.bf16.mxu0 %v3079_v47  ;;  %v2478_v19 = vld [vmem:[#allocation5 + $0x188] ss:$12 sps:$4 sm:$0xff]  }
  0x6e   :  { %715 = vmatprep.subr.bf16.mxu1 %v2273_v21  ;;  %3165 = vst [vmem:[#allocation48_spill] sm:$0xff] %v2478_v19  ;;  %v2486_v21 = vsub.f32 %v144_v61, %v150_v17  ;;  %v3168_v17 = vld [vmem:[#allocation29_spill] sm:$0xff] }
  0x6f   :  { %v3172_v61 = vld [vmem:[#allocation33_spill] sm:$0xff] }
  0x70   :  { %1836 = vmatpush3.bf16.msra.mxu0 %v2466_v11  ;;  %3166 = vst [vmem:[#allocation49_spill] sm:$0xff] %v2486_v21  ;;  %v3178_v21 = vld [vmem:[#allocation39_spill] sm:$0xff] }
  0x71   :  { %716 = vmatpush1.bf16.msra.mxu1 %v2279_v23  ;;  %1837 = vmatprep.subr.bf16.mxu0 %v3079_v47  ;;  %v2484_v23 = vsub.f32 %v2402_v53, %v151_v13  ;;  %v3167_v13 = vmov 0   ;;  %v3170_v53 = vld [vmem:[#allocation31_spill] sm:$0xff] }
  0x72   :  { %717 = vmatprep.subr.bf16.mxu1 %v2285_v25 }
  0x74   :  { %1838 = vmatpush3.bf16.msra.mxu0 %v2472_v15 }
  0x75   :  { %718 = vmatpush1.bf16.msra.mxu1 %v2291_v28  ;;  %1839 = vmatprep.subr.bf16.mxu0 %v3079_v47 }
  0x76   :  { %719 = vmatprep.subr.bf16.mxu1 %v2299_v31 }
  0x78   :  { %1840 = vmatpush3.bf16.msra.mxu0 %v2478_v19 }
  0x79   :  { %720 = vmatpush1.bf16.msra.mxu1 %v2306_v34  ;;  %746 = vmatprep.subr.bf16.mxu0 %v2219_v2 }
  0x7a   :  { %721 = vmatprep.subr.bf16.mxu1 %v2314_v37 }
  0x7b   :  { %1842 = vmatmul.mubr.bf16.vlgmr.msra.gmra.mxu0 %v2322_v39 }
  0x7c   :  { %747 = vmatpush1.bf16.msra.mxu0 %v2224_v4  ;;  %778 = vmatprep.mubr.bf16.mxu0 %v3167_v13 }
  0x7d   :  { %722 = vmatpush2.bf16.msra.mxu1 %v2324_v40  ;;  %748 = vmatprep.subr.bf16.mxu0 %v2231_v6 }
  0x7e   :  { %723 = vmatprep.subr.bf16.mxu1 %v2332_v42 }
  0x80   :  { %749 = vmatpush1.bf16.msra.mxu0 %v2236_v8 }
  0x81   :  { %724 = vmatpush2.bf16.msra.mxu1 %v2336_v44  ;;  %750 = vmatprep.subr.bf16.mxu0 %v2241_v10 }
  0x82   :  { %725 = vmatprep.subr.bf16.mxu1 %v2343_v46 }
  0x84   :  { %751 = vmatpush1.bf16.msra.mxu0 %v2245_v12 }
  0x85   :  { %726 = vmatpush2.bf16.msra.mxu1 %v2349_v48  ;;  %752 = vmatprep.subr.bf16.mxu0 %v2253_v14 }
  0x86   :  { %727 = vmatprep.subr.bf16.mxu1 %v2355_v50 }
  0x88   :  { %753 = vmatpush1.bf16.msra.mxu0 %v2259_v16 }
  0x89   :  { %728 = vmatpush2.bf16.msra.mxu1 %v2361_v52  ;;  %754 = vmatprep.subr.bf16.mxu0 %v2265_v18 }
  0x8a   :  { %729 = vmatprep.subr.bf16.mxu1 %v2367_v54 }
  0x8c   :  { %755 = vmatpush1.bf16.msra.mxu0 %v2269_v20 }
  0x8d   :  { %730 = vmatpush2.bf16.msra.mxu1 %v2373_v56  ;;  %756 = vmatprep.subr.bf16.mxu0 %v2277_v22 }
  0x8e   :  { %731 = vmatprep.subr.bf16.mxu1 %v2379_v58 }
  0x90   :  { %757 = vmatpush1.bf16.msra.mxu0 %v2283_v24 }
  0x91   :  { %732 = vmatpush2.bf16.msra.mxu1 %v2387_v63  ;;  %758 = vmatprep.subr.bf16.mxu0 %v2289_v26 }
  0x92   :  { %733 = vmatprep.subr.bf16.mxu1 %v2396_v36 }
  0x94   :  { %759 = vmatpush1.bf16.msra.mxu0 %v2293_v29 }
  0x95   :  { %734 = vmatpush2.bf16.msra.mxu1 %v2404_v51  ;;  %760 = vmatprep.subr.bf16.mxu0 %v2303_v32 }
  0x96   :  { %735 = vmatprep.subr.bf16.mxu1 %v2417_v59 }
  0x98   :  { %761 = vmatpush1.bf16.msra.mxu0 %v2308_v35 }
  0x99   :  { %736 = vmatpush2.bf16.msra.mxu1 %v2425_v27  ;;  %1670 = vmatprep.subr.bf16.mxu0 %v2318_v38  ;;  %v3176_v27 = vld [vmem:[#allocation37_spill] sm:$0xff] }
  0x9a   :  { %1845 = vmatprep.subr.bf16.mxu1 %v3079_v47 }
  0x9b   :  { %779 = vmatmul.mubr.bf16.vlgmr.msra.gmra.mxu0 %v2295_v30 }
  0x9c   :  { %738 = vmatmul.mubr.bf16.vlgmr.msra.gmra.mxu1 %v2392_v0  ;;  %1671 = vmatpush3.bf16.msra.mxu0 %v2328_v41 }
  0x9d   :  { %1846 = vmatpush3.bf16.msra.mxu1 %v2433_v43  ;;  %1672 = vmatprep.subr.bf16.mxu0 %v3168_v17  ;;  %v3174_v43 = vld [vmem:[#allocation35_spill] sm:$0xff] }
  0x9e   :  { %1847 = vmatprep.subr.bf16.mxu1 %v3079_v47  ;;  %819 = vmatprep.mubr.bf16.mxu0 %v2385_v62  ;;  %v3173_v62 = vld [vmem:[#allocation34_spill] sm:$0xff] }
  0x9f   :  { %1861 = vmatprep.mubr.msk.bf16.mxu1 %vm2193_vm0, %v3079_v47 }
  0xa0   :  { %1673 = vmatpush3.bf16.msra.mxu0 %v3169_v49 }
  0xa1   :  { %1848 = vmatpush3.bf16.msra.mxu1 %v2439_v60  ;;  %1674 = vmatprep.subr.bf16.mxu0 %v3170_v53  ;;  %v3175_v60 = vld [vmem:[#allocation36_spill] sm:$0xff] }
  0xa2   :  { %1849 = vmatprep.subr.bf16.mxu1 %v3079_v47 }
  0xa4   :  { %1675 = vmatpush3.bf16.msra.mxu0 %v3171_v55 }
  0xa5   :  { %1850 = vmatpush3.bf16.msra.mxu1 %v2448_v1  ;;  %1676 = vmatprep.subr.bf16.mxu0 %v3172_v61  ;;  %v3177_v1 = vld [vmem:[#allocation38_spill] sm:$0xff] }
  0xa6   :  { %1851 = vmatprep.subr.bf16.mxu1 %v3079_v47 }
  0xa8   :  { %1677 = vmatpush3.bf16.msra.mxu0 %v3173_v62 }
  0xa9   :  { %1852 = vmatpush3.bf16.msra.mxu1 %v2454_v5  ;;  %1678 = vmatprep.subr.bf16.mxu0 %v3174_v43 }
  0xaa   :  { %1853 = vmatprep.subr.bf16.mxu1 %v3079_v47 }
  0xac   :  { %1679 = vmatpush3.bf16.msra.mxu0 %v3175_v60 }
  0xad   :  { %1854 = vmatpush3.bf16.msra.mxu1 %v2460_v7  ;;  %1680 = vmatprep.subr.bf16.mxu0 %v3176_v27  ;;  %v3179_v7 = vld [vmem:[#allocation11_spill] sm:$0xff] }
  0xae   :  { %1855 = vmatprep.subr.bf16.mxu1 %v3079_v47 }
  0xb0   :  { %1681 = vmatpush3.bf16.msra.mxu0 %v3177_v1 }
  0xb1   :  { %1856 = vmatpush3.bf16.msra.mxu1 %v2466_v11  ;;  %1682 = vmatprep.subr.bf16.mxu0 %v3178_v21  ;;  %v157_v11 = vpack.c.bf16 %v2484_v23, %v2484_v23  ;;  %v3183_v23 = vld [vmem:[#allocation19_spill] sm:$0xff] }
  0xb2   :  { %1857 = vmatprep.subr.bf16.mxu1 %v3079_v47 }
  0xb4   :  { %1683 = vmatpush3.bf16.msra.mxu0 %v2413_v57 }
  0xb5   :  { %1858 = vmatpush3.bf16.msra.mxu1 %v2472_v15  ;;  %1684 = vmatprep.subr.bf16.mxu0 %v2419_v33 }
  0xb6   :  { %1859 = vmatprep.subr.bf16.mxu1 %v3079_v47  ;;  %v3180_v47 = vld [vmem:[#allocation12_spill] sm:$0xff] }
  0xb8   :  { %1685 = vmatpush3.bf16.msra.mxu0 %v2427_v45 }
  0xb9   :  { %1860 = vmatpush3.bf16.msra.mxu1 %v2478_v19  ;;  %867 = vmatprep.subr.bf16.mxu0 %v3179_v7  ;;  %v3181_v19 = vld [vmem:[#allocation14_spill] sm:$0xff] }
  0xba   :  { %908 = vmatprep.subr.bf16.mxu1 %v2219_v2 }
  0xbb   :  { %820 = vmatmul.mubr.bf16.vlgmr.msra.gmra.mxu0 %v2392_v0  ;;  %v3182_v0 = vld [vmem:[#allocation17_spill] sm:$0xff] }
  0xbc   :  { %1862 = vmatmul.mubr.bf16.vlgmr.msra.gmra.mxu1 %v2295_v30  ;;  %868 = vmatpush1.bf16.msra.mxu0 %v2222_v3  ;;  %v3184_v30 = vld [vmem:[#allocation20_spill] sm:$0xff] }
  0xbd   :  { %909 = vmatpush1.bf16.msra.mxu1 %v2224_v4  ;;  %869 = vmatprep.subr.bf16.mxu0 %v3180_v47 }
  0xbe   :  { %910 = vmatprep.subr.bf16.mxu1 %v2231_v6  ;;  %940 = vmatprep.mubr.bf16.mxu1 %v3167_v13  ;;  %v3185_v13 = vld [vmem:[#allocation22_spill] sm:$0xff]  ;;  %v3188_v6 = vld [vmem:[#allocation27_spill] sm:$0xff] }
  0xbf   :  { %899 = vmatprep.mubr.bf16.mxu0 %v157_v11 }
  0xc0   :  { %870 = vmatpush1.bf16.msra.mxu0 %v3181_v19 }
  0xc1   :  { %911 = vmatpush1.bf16.msra.mxu1 %v2236_v8  ;;  %871 = vmatprep.subr.bf16.mxu0 %v2239_v9  ;;  %v3186_v8 = vld [vmem:[#allocation24_spill] sm:$0xff] }
  0xc2   :  { %912 = vmatprep.subr.bf16.mxu1 %v2241_v10  ;;  %v3187_v10 = vld [vmem:[#allocation25_spill] sm:$0xff] }
  0xc4   :  { %872 = vmatpush1.bf16.msra.mxu0 %v3182_v0 }
  0xc5   :  { %913 = vmatpush1.bf16.msra.mxu1 %v2245_v12  ;;  %873 = vmatprep.subr.bf16.mxu0 %v3183_v23  ;;  %v152_v12 = vunpack.c.l.bf16 %v2322_v39  ;;  %v3191_v39 = vld [vmem:[#allocation49_spill] sm:$0xff] }
  0xc6   :  { %914 = vmatprep.subr.bf16.mxu1 %v2253_v14 }
  0xc8   :  { %874 = vmatpush1.bf16.msra.mxu0 %v3184_v30 }
  0xc9   :  { %915 = vmatpush1.bf16.msra.mxu1 %v2259_v16  ;;  %875 = vmatprep.subr.bf16.mxu0 %v3185_v13  ;;  %v3189_v16 = vld [vmem:[#allocation28_spill] sm:$0xff] }
  0xca   :  { %916 = vmatprep.subr.bf16.mxu1 %v2265_v18  ;;  %v155_v18 = vsub.f32 %v3189_v16, %v152_v12 }
  0xcc   :  { %876 = vmatpush1.bf16.msra.mxu0 %v3186_v8 }
  0xcd   :  { %917 = vmatpush1.bf16.msra.mxu1 %v2269_v20  ;;  %877 = vmatprep.subr.bf16.mxu0 %v3187_v10 }
  0xce   :  { %918 = vmatprep.subr.bf16.mxu1 %v2277_v22  ;;  %v2598_v22 = vpack.c.bf16 %v155_v18, %v155_v18 }
  0xd0   :  { %878 = vmatpush1.bf16.msra.mxu0 %v3188_v6 }
  0xd1   :  { %919 = vmatpush1.bf16.msra.mxu1 %v2283_v24  ;;  %879 = vmatprep.subr.bf16.mxu0 %v2285_v25 }
  0xd2   :  { %920 = vmatprep.subr.bf16.mxu1 %v2289_v26 }
  0xd4   :  { %880 = vmatpush1.bf16.msra.mxu0 %v2291_v28 }
  0xd5   :  { %921 = vmatpush1.bf16.msra.mxu1 %v2293_v29  ;;  %881 = vmatprep.subr.bf16.mxu0 %v2299_v31 }
  0xd6   :  { %922 = vmatprep.subr.bf16.mxu1 %v2303_v32 }
  0xd8   :  { %882 = vmatpush1.bf16.msra.mxu0 %v2306_v34 }
  0xd9   :  { %923 = vmatpush1.bf16.msra.mxu1 %v2308_v35  ;;  %883 = vmatprep.subr.bf16.mxu0 %v2314_v37 }
  0xda   :  { %1701 = vmatprep.subr.bf16.mxu1 %v2318_v38 }
  0xdc   :  { %941 = vmatmul.mubr.bf16.vlgmr.msra.gmra.mxu1 %v2598_v22  ;;  %884 = vmatpush2.bf16.msra.mxu0 %v2324_v40 }
  0xdd   :  { %1702 = vmatpush3.bf16.msra.mxu1 %v2328_v41  ;;  %885 = vmatprep.subr.bf16.mxu0 %v2332_v42 }
  0xde   :  { %1703 = vmatprep.subr.bf16.mxu1 %v3168_v17  ;;  %981 = vmatprep.mubr.bf16.mxu1 %v157_v11  ;;  %v1036_v11 = vld [vmem:[#allocation2 + $0x20] sm:$0xff] }
  0xdf   :  { %v2625_v12 = vpack.c.bf16 %v1036_v11, %v1036_v11 }
  0xe0   :  { %886 = vmatpush2.bf16.msra.mxu0 %v2336_v44 }
  0xe1   :  { %1704 = vmatpush3.bf16.msra.mxu1 %v3169_v49  ;;  %887 = vmatprep.subr.bf16.mxu0 %v2343_v46  ;;  %3190 = vst [vmem:[#allocation29_spill] sm:$0xff] %v2625_v12  ;;  %v1042_v16 = vunpack.c.l.bf16 %v2625_v12 }
  0xe2   :  { %1705 = vmatprep.subr.bf16.mxu1 %v3170_v53 }
  0xe3   :  { %v2636_v18 = vsub.f32 %v1036_v11, %v1042_v16  ;;  %v3194_v11 = vld [vmem:[#allocation42_spill] sm:$0xff] }
  0xe4   :  { %888 = vmatpush2.bf16.msra.mxu0 %v2349_v48 }
  0xe5   :  { %1706 = vmatpush3.bf16.msra.mxu1 %v3171_v55  ;;  %889 = vmatprep.subr.bf16.mxu0 %v2355_v50  ;;  %v2646_v12 = vpack.c.bf16 %v2636_v18, %v2636_v18 }
  0xe6   :  { %1707 = vmatprep.subr.bf16.mxu1 %v3172_v61 }
  0xe8   :  { %890 = vmatpush2.bf16.msra.mxu0 %v2361_v52 }
  0xe9   :  { %1708 = vmatpush3.bf16.msra.mxu1 %v3173_v62  ;;  %891 = vmatprep.subr.bf16.mxu0 %v2367_v54 }
  0xea   :  { %1709 = vmatprep.subr.bf16.mxu1 %v3174_v43 }
  0xec   :  { %892 = vmatpush2.bf16.msra.mxu0 %v2373_v56 }
  0xed   :  { %1710 = vmatpush3.bf16.msra.mxu1 %v3175_v60  ;;  %893 = vmatprep.subr.bf16.mxu0 %v2379_v58 }
  0xee   :  { %1711 = vmatprep.subr.bf16.mxu1 %v3176_v27  ;;  %v156_v27 = vpack.c.bf16 %v3191_v39, %v3191_v39  ;;  %v3195_v39 = vld [vmem:[#allocation43_spill] sm:$0xff] }
  0xf0   :  { %894 = vmatpush2.bf16.msra.mxu0 %v2387_v63 }
  0xf1   :  { %1712 = vmatpush3.bf16.msra.mxu1 %v3177_v1  ;;  %895 = vmatprep.subr.bf16.mxu0 %v2396_v36  ;;  %v3192_v1 = vld [vmem:[#allocation41_spill] sm:$0xff] }
  0xf2   :  { %1713 = vmatprep.subr.bf16.mxu1 %v3178_v21  ;;  %v3193_v21 = vmov 0.0  }
  0xf4   :  { %896 = vmatpush2.bf16.msra.mxu0 %v2404_v51 }
  0xf5   :  { %1714 = vmatpush3.bf16.msra.mxu1 %v2413_v57  ;;  %897 = vmatprep.subr.bf16.mxu0 %v2417_v59 }
  0xf6   :  { %1715 = vmatprep.subr.bf16.mxu1 %v2419_v33 }
  0xf8   :  { %898 = vmatpush2.bf16.msra.mxu0 %v3192_v1 }
  0xf9   :  { %1716 = vmatpush3.bf16.msra.mxu1 %v2427_v45  ;;  %1865 = vmatprep.subr.bf16.mxu0 %v3193_v21 }
  0xfa   :  { %1059 = vmatprep.subr.bf16.mxu1 %v3179_v7 }
  0xfb   :  { %900 = vmatmul.mubr.bf16.vlgmr.msra.gmra.mxu0 %v156_v27 }
  0xfc   :  { %v618_v57 = vpop.f32.mrf.mxu1  ;;  %982 = vmatmul.mubr.bf16.vlgmr.msra.gmra.mxu1 %v156_v27  ;;  %1866 = vmatpush3.bf16.msra.mxu0 %v3194_v11 }
  0xfd   :  { %1060 = vmatpush1.bf16.msra.mxu1 %v2222_v3  ;;  %1867 = vmatprep.subr.bf16.mxu0 %v3193_v21  ;;  %v3196_v3 = vld [vmem:[#allocation44_spill] sm:$0xff] }
  0xfe   :  { %v620_v16 = vpop.f32.mrf.mxu1  ;;  %1061 = vmatprep.subr.bf16.mxu1 %v3180_v47  ;;  %1881 = vmatprep.mubr.msk.bf16.mxu0 %vm2193_vm0, %v3193_v21  ;;  %v3200_v47 = vld [vmem:[#allocation13_spill] sm:$0xff] }
  0xff   :  { %1091 = vmatprep.mubr.bf16.mxu1 %v2646_v12 }
 0x100   :  { %v622_v7 = vpop.f32.mrf.mxu1  ;;  %1868 = vmatpush3.bf16.msra.mxu0 %v3195_v39 }
 0x101   :  { %1062 = vmatpush1.bf16.msra.mxu1 %v3181_v19  ;;  %1869 = vmatprep.subr.bf16.mxu0 %v3193_v21  ;;  %v3197_v19 = vld [vmem:[#allocation45_spill] sm:$0xff]  ;;  %v1037_v7 = vld [vmem:[#allocation2 + $0x28] sm:$0xff] }
 0x102   :  { %v623_v27 = vpop.f32.mrf.mxu1  ;;  %1063 = vmatprep.subr.bf16.mxu1 %v2239_v9  ;;  %v3198_v9 = vld [vmem:[#allocation46_spill] sm:$0xff] }
 0x103   :  { %v3206_v27 = vld [vmem:[#allocation23_spill] sm:$0xff] }
 0x104   :  { %1870 = vmatpush3.bf16.msra.mxu0 %v3196_v3 }
 0x105   :  { %1064 = vmatpush1.bf16.msra.mxu1 %v3182_v0  ;;  %1871 = vmatprep.subr.bf16.mxu0 %v3193_v21 }
 0x106   :  { %1065 = vmatprep.subr.bf16.mxu1 %v3183_v23  ;;  %v3204_v23 = vld [vmem:[#allocation18_spill] sm:$0xff] }
 0x108   :  { %1872 = vmatpush3.bf16.msra.mxu0 %v2454_v5 }
 0x109   :  { %1066 = vmatpush1.bf16.msra.mxu1 %v3184_v30  ;;  %1873 = vmatprep.subr.bf16.mxu0 %v3193_v21  ;;  %v3205_v30 = vld [vmem:[#allocation21_spill] sm:$0xff] }
 0x10a   :  { %1067 = vmatprep.subr.bf16.mxu1 %v3185_v13 }
 0x10c   :  { %1874 = vmatpush3.bf16.msra.mxu0 %v3197_v19 }
 0x10d   :  { %1068 = vmatpush1.bf16.msra.mxu1 %v3186_v8  ;;  %1875 = vmatprep.subr.bf16.mxu0 %v3193_v21  ;;  %v3199_v8 = vld [vmem:[#allocation48_spill] sm:$0xff] }
 0x10e   :  { %1069 = vmatprep.subr.bf16.mxu1 %v3187_v10 }
 0x110   :  { %1876 = vmatpush3.bf16.msra.mxu0 %v3198_v9 }
 0x111   :  { %1070 = vmatpush1.bf16.msra.mxu1 %v3188_v6  ;;  %1877 = vmatprep.subr.bf16.mxu0 %v3193_v21 }
 0x112   :  { %1071 = vmatprep.subr.bf16.mxu1 %v2285_v25 }
 0x114   :  { %1878 = vmatpush3.bf16.msra.mxu0 %v2472_v15 }
 0x115   :  { %1072 = vmatpush1.bf16.msra.mxu1 %v2291_v28  ;;  %1879 = vmatprep.subr.bf16.mxu0 %v3193_v21 }
 0x116   :  { %1073 = vmatprep.subr.bf16.mxu1 %v2299_v31 }
 0x118   :  { %1880 = vmatpush3.bf16.msra.mxu0 %v3199_v8 }
 0x119   :  { %1074 = vmatpush1.bf16.msra.mxu1 %v2306_v34  ;;  %1100 = vmatprep.subr.bf16.mxu0 %v2219_v2  ;;  %v3201_v2 = vmov 0  }
 0x11a   :  { %1075 = vmatprep.subr.bf16.mxu1 %v2314_v37 }
 0x11b   :  { %v577_v6 = vpop.f32.mrf.mxu0  ;;  %1882 = vmatmul.mubr.bf16.vlgmr.msra.gmra.mxu0 %v2598_v22  ;;  %v3202_v22 = vld [vmem:[#allocation15_spill] sm:$0xff] }
 0x11c   :  { %v1655_v10 = vpop.f32.mrf.mxu1  ;;  %v2684_v25 = vadd.f32 %v618_v57, %v577_v6  ;;  %1101 = vmatpush1.bf16.msra.mxu0 %v2224_v4  ;;  %1132 = vmatprep.mubr.bf16.mxu0 %v3201_v2  ;;  %v3203_v4 = vld [vmem:[#allocation16_spill] sm:$0xff] }
 0x11d   :  { %1076 = vmatpush2.bf16.msra.mxu1 %v2324_v40  ;;  %v579_v28 = vpop.f32.mrf.mxu0  ;;  %1102 = vmatprep.subr.bf16.mxu0 %v3200_v47 }
 0x11e   :  { %v1656_v31 = vpop.f32.mrf.mxu1  ;;  %1077 = vmatprep.subr.bf16.mxu1 %v2332_v42  ;;  %v2690_v34 = vadd.f32 %v620_v16, %v579_v28  ;;  %v1035_v16 = vld [vmem:[#allocation2 + $0x18] sm:$0xff] }
 0x11f   :  { %v1657_v37 = vadd.f32 %v1656_v31, %v1655_v10  ;;  %v581_v13 = vpop.f32.mrf.mxu0  ;;  %v2705_v6 = vpack.c.bf16 %v1035_v16, %v1035_v16  ;;  %v2707_v10 = vpack.c.bf16 %v1037_v7, %v1037_v7 }
 0x120   :  { %v1658_v0 = vpop.f32.mrf.mxu1  ;;  %1103 = vmatpush1.bf16.msra.mxu0 %v3202_v22  ;;  %v3215_v22 = vld [vmem:[#allocation39_spill] sm:$0xff] }
 0x121   :  { %1078 = vmatpush2.bf16.msra.mxu1 %v2336_v44  ;;  %v582_v40 = vpop.f32.mrf.mxu0  ;;  %1104 = vmatprep.subr.bf16.mxu0 %v3203_v4  ;;  %3207 = vst [vmem:[#allocation30_spill] sm:$0xff] %v2707_v10  ;;  %v1041_v28 = vunpack.c.l.bf16 %v2705_v6  ;;  %v1043_v31 = vunpack.c.l.bf16 %v2707_v10  ;;  %v3214_v0 = vld [vmem:[#allocation38_spill] sm:$0xff] }
 0x122   :  { %v1659_v57 = vpop.f32.mrf.mxu1  ;;  %1079 = vmatprep.subr.bf16.mxu1 %v2343_v46  ;;  %v3216_v40 = vld [vmem:[#allocation40_spill] sm:$0xff] }
 0x123   :  { %v2719_v47 = vsub.f32 %v1035_v16, %v1041_v28  ;;  %v2721_v13 = vsub.f32 %v1037_v7, %v1043_v31  ;;  %v2776_v57 = vld [vmem:[#allocation5 + $0xac] ss:$12 sps:$4 sm:$0xff]   ;;  %v2785_v7 = vld [vmem:[#allocation5 + $0xa8] ss:$12 sps:$4 sm:$0xff]  }
 0x124   :  { %1105 = vmatpush1.bf16.msra.mxu0 %v3204_v23  ;;  %v2779_v4 = vld [vmem:[#allocation5 + $0x22c] ss:$12 sps:$4 sm:$0xff]   ;;  %v2791_v31 = vld [vmem:[#allocation5 + $0x94] ss:$12 sps:$4 sm:$0xff]  }
 0x125   :  { %1080 = vmatpush2.bf16.msra.mxu1 %v2349_v48  ;;  %1106 = vmatprep.subr.bf16.mxu0 %v2253_v14  ;;  %v3208_v14 = vld [vmem:[#allocation26_spill] sm:$0xff]  ;;  %3209 = vst [vmem:[#allocation31_spill] sm:$0xff] %v2719_v47  ;;  %3210 = vst [vmem:[#allocation32_spill] sm:$0xff] %v2721_v13 }
 0x126   :  { %1081 = vmatprep.subr.bf16.mxu1 %v2355_v50  ;;  %3217 = vst [vmem:[#allocation35_spill] sm:$0xff] %v2779_v4 }
 0x128   :  { %1107 = vmatpush1.bf16.msra.mxu0 %v3205_v30 }
 0x129   :  { %1082 = vmatpush2.bf16.msra.mxu1 %v2361_v52  ;;  %1108 = vmatprep.subr.bf16.mxu0 %v3206_v27  ;;  %v2788_v27 = vld [vmem:[#allocation5 + $0x228] ss:$12 sps:$4 sm:$0xff]  }
 0x12a   :  { %1083 = vmatprep.subr.bf16.mxu1 %v2367_v54  ;;  %3218 = vst [vmem:[#allocation36_spill] sm:$0xff] %v2788_v27 }
 0x12c   :  { %1109 = vmatpush1.bf16.msra.mxu0 %v2269_v20  ;;  %v2729_v20 = vpack.c.bf16 %v2719_v47, %v2719_v47  ;;  %v2804_v47 = vld [vmem:[#allocation5 + $0x90] ss:$12 sps:$4 sm:$0xff]  }
 0x12d   :  { %1084 = vmatpush2.bf16.msra.mxu1 %v2373_v56  ;;  %1110 = vmatprep.subr.bf16.mxu0 %v3208_v14 }
 0x12e   :  { %1085 = vmatprep.subr.bf16.mxu1 %v2379_v58  ;;  %3211 = vst [vmem:[#allocation33_spill] sm:$0xff] %v2729_v20 }
 0x130   :  { %1111 = vmatpush1.bf16.msra.mxu0 %v2283_v24  ;;  %v2733_v24 = vpack.c.bf16 %v2721_v13, %v2721_v13 }
 0x131   :  { %1086 = vmatpush2.bf16.msra.mxu1 %v2387_v63  ;;  %1112 = vmatprep.subr.bf16.mxu0 %v2289_v26 }
 0x132   :  { %1087 = vmatprep.subr.bf16.mxu1 %v2396_v36  ;;  %3212 = vst [vmem:[#allocation34_spill] sm:$0xff] %v2733_v24 }
 0x134   :  { %1113 = vmatpush1.bf16.msra.mxu0 %v2293_v29 }
 0x135   :  { %1088 = vmatpush2.bf16.msra.mxu1 %v2404_v51  ;;  %1114 = vmatprep.subr.bf16.mxu0 %v2303_v32 }
 0x136   :  { %1089 = vmatprep.subr.bf16.mxu1 %v2417_v59 }
 0x138   :  { %1115 = vmatpush1.bf16.msra.mxu0 %v2308_v35 }
 0x139   :  { %1090 = vmatpush2.bf16.msra.mxu1 %v3192_v1  ;;  %1732 = vmatprep.subr.bf16.mxu0 %v2318_v38 }
 0x13a   :  { %1885 = vmatprep.subr.bf16.mxu1 %v3193_v21 }
 0x13b   :  { %v699_v26 = vpop.f32.mrf.mxu0  ;;  %1133 = vmatmul.mubr.bf16.vlgmr.msra.gmra.mxu0 %v2733_v24 }
 0x13c   :  { %1092 = vmatmul.mubr.bf16.vlgmr.msra.gmra.mxu1 %v2729_v20  ;;  %v2741_v29 = vadd.f32 %v1657_v37, %v699_v26  ;;  %1733 = vmatpush3.bf16.msra.mxu0 %v2328_v41  ;;  %v3213_v37 = vld [vmem:[#allocation37_spill] sm:$0xff] }
 0x13d   :  { %1886 = vmatpush3.bf16.msra.mxu1 %v3194_v11  ;;  %v1843_v32 = vpop.f32.mrf.mxu0  ;;  %1734 = vmatprep.subr.bf16.mxu0 %v3168_v17  ;;  %v2794_v26 = vld [vmem:[#allocation5 + $0x214] ss:$12 sps:$4 sm:$0xff]  }
 0x13e   :  { %1887 = vmatprep.subr.bf16.mxu1 %v3193_v21  ;;  %1173 = vmatprep.mubr.bf16.mxu0 %v2646_v12  ;;  %3219 = vst [vmem:[#allocation11_spill] sm:$0xff] %v2794_v26 }
 0x13f   :  { %1901 = vmatprep.mubr.msk.bf16.mxu1 %vm2193_vm0, %v3193_v21  ;;  %v702_v35 = vpop.f32.mrf.mxu0 }
 0x140   :  { %1735 = vmatpush3.bf16.msra.mxu0 %v3169_v49  ;;  %v3221_v35 = vld [vmem:[#allocation29_spill] sm:$0xff] }
 0x141   :  { %1888 = vmatpush3.bf16.msra.mxu1 %v3195_v39  ;;  %v1844_v38 = vpop.f32.mrf.mxu0  ;;  %1736 = vmatprep.subr.bf16.mxu0 %v3170_v53 }
 0x142   :  { %1889 = vmatprep.subr.bf16.mxu1 %v3193_v21 }
 0x144   :  { %1737 = vmatpush3.bf16.msra.mxu0 %v3171_v55 }
 0x145   :  { %1890 = vmatpush3.bf16.msra.mxu1 %v3196_v3  ;;  %1738 = vmatprep.subr.bf16.mxu0 %v3172_v61 }
 0x146   :  { %1891 = vmatprep.subr.bf16.mxu1 %v3193_v21 }
 0x148   :  { %1739 = vmatpush3.bf16.msra.mxu0 %v3173_v62 }
 0x149   :  { %1892 = vmatpush3.bf16.msra.mxu1 %v2454_v5  ;;  %1740 = vmatprep.subr.bf16.mxu0 %v3174_v43 }
 0x14a   :  { %1893 = vmatprep.subr.bf16.mxu1 %v3193_v21 }
 0x14c   :  { %1741 = vmatpush3.bf16.msra.mxu0 %v3175_v60 }
 0x14d   :  { %1894 = vmatpush3.bf16.msra.mxu1 %v3197_v19  ;;  %1742 = vmatprep.subr.bf16.mxu0 %v3213_v37 }
 0x14e   :  { %1895 = vmatprep.subr.bf16.mxu1 %v3193_v21 }
 0x150   :  { %1743 = vmatpush3.bf16.msra.mxu0 %v3214_v0 }
 0x151   :  { %1896 = vmatpush3.bf16.msra.mxu1 %v3198_v9  ;;  %1744 = vmatprep.subr.bf16.mxu0 %v3215_v22 }
 0x152   :  { %1897 = vmatprep.subr.bf16.mxu1 %v3193_v21 }
 0x154   :  { %1745 = vmatpush3.bf16.msra.mxu0 %v3216_v40 }
 0x155   :  { %1898 = vmatpush3.bf16.msra.mxu1 %v2472_v15  ;;  %1746 = vmatprep.subr.bf16.mxu0 %v2419_v33 }
 0x156   :  { %1899 = vmatprep.subr.bf16.mxu1 %v3193_v21 }
 0x158   :  { %1747 = vmatpush3.bf16.msra.mxu0 %v2427_v45 }
 0x159   :  { %1900 = vmatpush3.bf16.msra.mxu1 %v3199_v8  ;;  %1221 = vmatprep.subr.bf16.mxu0 %v2776_v57 }
 0x15a   :  { %1262 = vmatprep.subr.bf16.mxu1 %v2779_v4  ;;  %v2882_v4 = vld [vmem:[#allocation5 + $0x16c] ss:$12 sps:$4 sm:$0xff]  }
 0x15b   :  { %v780_v30 = vpop.f32.mrf.mxu0  ;;  %1174 = vmatmul.mubr.bf16.vlgmr.msra.gmra.mxu0 %v2729_v20  ;;  %v2810_v20 = vld [vmem:[#allocation5 + $0x7c] ss:$12 sps:$4 sm:$0xff]   ;;  %3239 = vst [vmem:[#allocation15_spill] sm:$0xff] %v2882_v4 }
 0x15c   :  { %v739_v23 = vpop.f32.mrf.mxu1  ;;  %1902 = vmatmul.mubr.bf16.vlgmr.msra.gmra.mxu1 %v2733_v24  ;;  %1222 = vmatpush1.bf16.msra.mxu0 %v2785_v7  ;;  %v2807_v24 = vld [vmem:[#allocation5 + $0x210] ss:$12 sps:$4 sm:$0xff]  }
 0x15d   :  { %v740_v16 = vadd.f32 %v739_v23, %v2684_v25  ;;  %1263 = vmatpush1.bf16.msra.mxu1 %v2788_v27  ;;  %v782_v28 = vpop.f32.mrf.mxu0  ;;  %1223 = vmatprep.subr.bf16.mxu0 %v2791_v31  ;;  %3223 = vst [vmem:[#allocation17_spill] sm:$0xff] %v2807_v24  ;;  %v2876_v27 = vld [vmem:[#allocation5] ss:$12 sps:$4 sm:$0xff]  }
 0x15e   :  { %v741_v14 = vpop.f32.mrf.mxu1  ;;  %1264 = vmatprep.subr.bf16.mxu1 %v2794_v26  ;;  %1294 = vmatprep.mubr.bf16.mxu1 %v3201_v2  ;;  %v2858_v2 = vld [vmem:[#allocation5 + $0x1c] ss:$12 sps:$4 sm:$0xff]   ;;  %v2870_v26 = vld [vmem:[#allocation5 + $0x4] ss:$12 sps:$4 sm:$0xff]   ;;  %3237 = vst [vmem:[#allocation46_spill] sm:$0xff] %v2876_v27 }
 0x15f   :  { %v2797_v32 = vadd.f32 %v780_v30, %v740_v16  ;;  %v742_v25 = vadd.f32 %v741_v14, %v2690_v34  ;;  %1253 = vmatprep.mubr.bf16.mxu0 %v3221_v35  ;;  %v784_v23 = vpop.f32.mrf.mxu0  ;;  %v2813_v34 = vld [vmem:[#allocation5 + $0x1fc] ss:$12 sps:$4 sm:$0xff]   ;;  %v2816_v14 = vld [vmem:[#allocation5 + $0x78] ss:$12 sps:$4 sm:$0xff]   ;;  %3235 = vst [vmem:[#allocation44_spill] sm:$0xff] %v2870_v26 }
 0x160   :  { %v743_v38 = vpop.f32.mrf.mxu1  ;;  %1224 = vmatpush1.bf16.msra.mxu0 %v2804_v47  ;;  %3224 = vst [vmem:[#allocation19_spill] sm:$0xff] %v2813_v34  ;;  %v2828_v23 = vld [vmem:[#allocation5 + $0x60] ss:$12 sps:$4 sm:$0xff]  }
 0x161   :  { %3220 = vst [vmem:[#allocation12_spill] sm:$0xff] %v2797_v32  ;;  %v2802_v13 = vadd.f32 %v782_v28, %v742_v25  ;;  %1265 = vmatpush1.bf16.msra.mxu1 %v2807_v24  ;;  %v785_v16 = vpop.f32.mrf.mxu0  ;;  %1225 = vmatprep.subr.bf16.mxu0 %v2810_v20  ;;  %v2819_v28 = vld [vmem:[#allocation5 + $0x1f8] ss:$12 sps:$4 sm:$0xff]   ;;  %v2846_v24 = vld [vmem:[#allocation5 + $0x34] ss:$12 sps:$4 sm:$0xff]  }
 0x162   :  { %v744_v30 = vpop.f32.mrf.mxu1  ;;  %1266 = vmatprep.subr.bf16.mxu1 %v2813_v34  ;;  %3225 = vst [vmem:[#allocation20_spill] sm:$0xff] %v2819_v28  ;;  %v2822_v25 = vld [vmem:[#allocation5 + $0x64] ss:$12 sps:$4 sm:$0xff]   ;;  %v2834_v16 = vld [vmem:[#allocation5 + $0x4c] ss:$12 sps:$4 sm:$0xff]  }
 0x163   :  { %3222 = vst [vmem:[#allocation14_spill] sm:$0xff] %v2802_v13  ;;  %v2825_v38 = vld [vmem:[#allocation5 + $0x1e4] ss:$12 sps:$4 sm:$0xff]   ;;  %v2831_v30 = vld [vmem:[#allocation5 + $0x1e0] ss:$12 sps:$4 sm:$0xff]  }
 0x164   :  { %1226 = vmatpush1.bf16.msra.mxu0 %v2816_v14  ;;  %3226 = vst [vmem:[#allocation22_spill] sm:$0xff] %v2825_v38  ;;  %3227 = vst [vmem:[#allocation24_spill] sm:$0xff] %v2831_v30  ;;  %v2840_v34 = vld [vmem:[#allocation5 + $0x48] ss:$12 sps:$4 sm:$0xff]   ;;  %v2852_v13 = vld [vmem:[#allocation5 + $0x30] ss:$12 sps:$4 sm:$0xff]  }
 0x165   :  { %1267 = vmatpush1.bf16.msra.mxu1 %v2819_v28  ;;  %1227 = vmatprep.subr.bf16.mxu0 %v2822_v25  ;;  %v2837_v28 = vld [vmem:[#allocation5 + $0x1cc] ss:$12 sps:$4 sm:$0xff]  }
 0x166   :  { %1268 = vmatprep.subr.bf16.mxu1 %v2825_v38  ;;  %3228 = vst [vmem:[#allocation25_spill] sm:$0xff] %v2837_v28  ;;  %v2843_v38 = vld [vmem:[#allocation5 + $0x1c8] ss:$12 sps:$4 sm:$0xff]   ;;  %v2864_v32 = vld [vmem:[#allocation5 + $0x18] ss:$12 sps:$4 sm:$0xff]  }
 0x167   :  { %3229 = vst [vmem:[#allocation27_spill] sm:$0xff] %v2843_v38  ;;  %3233 = vst [vmem:[#allocation42_spill] sm:$0xff] %v2864_v32 }
 0x168   :  { %1228 = vmatpush1.bf16.msra.mxu0 %v2828_v23 }
 0x169   :  { %1269 = vmatpush1.bf16.msra.mxu1 %v2831_v30  ;;  %1229 = vmatprep.subr.bf16.mxu0 %v2834_v16  ;;  %v2849_v30 = vld [vmem:[#allocation5 + $0x1b4] ss:$12 sps:$4 sm:$0xff]  }
 0x16a   :  { %1270 = vmatprep.subr.bf16.mxu1 %v2837_v28  ;;  %3230 = vst [vmem:[#allocation28_spill] sm:$0xff] %v2849_v30  ;;  %v2855_v28 = vld [vmem:[#allocation5 + $0x1b0] ss:$12 sps:$4 sm:$0xff]  }
 0x16b   :  { %3231 = vst [vmem:[#allocation49_spill] sm:$0xff] %v2855_v28 }
 0x16c   :  { %1230 = vmatpush1.bf16.msra.mxu0 %v2840_v34 }
 0x16d   :  { %1271 = vmatpush1.bf16.msra.mxu1 %v2843_v38  ;;  %1231 = vmatprep.subr.bf16.mxu0 %v2846_v24  ;;  %v2861_v38 = vld [vmem:[#allocation5 + $0x19c] ss:$12 sps:$4 sm:$0xff]  }
 0x16e   :  { %1272 = vmatprep.subr.bf16.mxu1 %v2849_v30  ;;  %3232 = vst [vmem:[#allocation41_spill] sm:$0xff] %v2861_v38  ;;  %v2867_v30 = vld [vmem:[#allocation5 + $0x198] ss:$12 sps:$4 sm:$0xff]  }
 0x16f   :  { %3234 = vst [vmem:[#allocation43_spill] sm:$0xff] %v2867_v30 }
 0x170   :  { %1232 = vmatpush1.bf16.msra.mxu0 %v2852_v13 }
 0x171   :  { %1273 = vmatpush1.bf16.msra.mxu1 %v2855_v28  ;;  %1233 = vmatprep.subr.bf16.mxu0 %v2858_v2  ;;  %v2873_v28 = vld [vmem:[#allocation5 + $0x184] ss:$12 sps:$4 sm:$0xff]  }
 0x172   :  { %1274 = vmatprep.subr.bf16.mxu1 %v2861_v38  ;;  %3236 = vst [vmem:[#allocation45_spill] sm:$0xff] %v2873_v28  ;;  %v2879_v38 = vld [vmem:[#allocation5 + $0x180] ss:$12 sps:$4 sm:$0xff]  }
 0x173   :  { %3238 = vst [vmem:[#allocation13_spill] sm:$0xff] %v2879_v38 }
 0x174   :  { %1234 = vmatpush1.bf16.msra.mxu0 %v2864_v32 }
 0x175   :  { %1275 = vmatpush1.bf16.msra.mxu1 %v2867_v30  ;;  %1235 = vmatprep.subr.bf16.mxu0 %v2870_v26  ;;  %v2885_v30 = vld [vmem:[#allocation5 + $0x170] ss:$12 sps:$4 sm:$0xff]  }
 0x176   :  { %1276 = vmatprep.subr.bf16.mxu1 %v2873_v28  ;;  %3240 = vst [vmem:[#allocation16_spill] sm:$0xff] %v2885_v30  ;;  %v2889_v28 = vld [vmem:[#allocation5 + $0x168] ss:$12 sps:$4 sm:$0xff]  }
 0x177   :  { %3241 = vst [vmem:[#allocation18_spill] sm:$0xff] %v2889_v28 }
 0x178   :  { %1236 = vmatpush1.bf16.msra.mxu0 %v2876_v27 }
 0x179   :  { %1277 = vmatpush1.bf16.msra.mxu1 %v2879_v38  ;;  %1237 = vmatprep.subr.bf16.mxu0 %v2882_v4 }
 0x17a   :  { %1763 = vmatprep.subr.bf16.mxu1 %v2885_v30 }
 0x17b   :  { %v1686_v8 = vpop.f32.mrf.mxu0 }
 0x17c   :  { %v861_v26 = vpop.f32.mrf.mxu1  ;;  %1295 = vmatmul.mubr.bf16.vlgmr.msra.gmra.mxu1 %v2707_v10  ;;  %1238 = vmatpush2.bf16.msra.mxu0 %v2889_v28 }
 0x17d   :  { %1764 = vmatpush3.bf16.msra.mxu1 %v2328_v41  ;;  %v1687_v27 = vpop.f32.mrf.mxu0  ;;  %1239 = vmatprep.subr.bf16.mxu0 %v2332_v42 }
 0x17e   :  { %v1863_v38 = vpop.f32.mrf.mxu1  ;;  %1765 = vmatprep.subr.bf16.mxu1 %v3168_v17  ;;  %v1688_v4 = vadd.f32 %v1687_v27, %v1686_v8  ;;  %1335 = vmatprep.mubr.bf16.mxu1 %v3221_v35  ;;  %v3256_v8 = vld [vmem:[#allocation17_spill] sm:$0xff]  ;;  %v3263_v27 = vld [vmem:[#allocation28_spill] sm:$0xff] }
 0x17f   :  { %v1689_v30 = vpop.f32.mrf.mxu0  ;;  %v3268_v38 = vld [vmem:[#allocation31_spill] sm:$0xff] }
 0x180   :  { %v864_v32 = vpop.f32.mrf.mxu1  ;;  %v822_v15 = vadd.f32 %v1688_v4, %v2741_v29  ;;  %1240 = vmatpush2.bf16.msra.mxu0 %v2336_v44  ;;  %v3259_v29 = vld [vmem:[#allocation22_spill] sm:$0xff]  ;;  %v3262_v4 = vld [vmem:[#allocation27_spill] sm:$0xff]  ;;  %v3269_v30 = vld [vmem:[#allocation32_spill] sm:$0xff] }
 0x181   :  { %1766 = vmatpush3.bf16.msra.mxu1 %v3169_v49  ;;  %v1690_v28 = vpop.f32.mrf.mxu0  ;;  %1241 = vmatprep.subr.bf16.mxu0 %v2343_v46  ;;  %v3243_v46 = vld [vmem:[#allocation42_spill] sm:$0xff] }
 0x182   :  { %v1864_v10 = vpop.f32.mrf.mxu1  ;;  %1767 = vmatprep.subr.bf16.mxu1 %v3170_v53  ;;  %v2901_v41 = vadd.f32 %v861_v26, %v822_v15  ;;  %v1051_v15 = vunpack.c.l.bf16 %v2646_v12  ;;  %v2084_v53 = vld [vmem:[#allocation5 + $0x154] ss:$12 sps:$4 sm:$0xff]   ;;  %v3265_v32 = vld [vmem:[#allocation34_spill] sm:$0xff] }
 0x183   :  { %v2086_v10 = vld [vmem:[#allocation5 + $0x13c] ss:$12 sps:$4 sm:$0xff]   ;;  %v1052_v35 = vunpack.c.l.bf16 %v3265_v32 }
 0x184   :  { %1242 = vmatpush2.bf16.msra.mxu0 %v2349_v48  ;;  %v1054_v42 = vsub.f32 %v2636_v18, %v1051_v15  ;;  %v3244_v48 = vld [vmem:[#allocation44_spill] sm:$0xff]  ;;  %v3254_v18 = vmov 0  }
 0x185   :  { %1768 = vmatpush3.bf16.msra.mxu1 %v3171_v55  ;;  %1243 = vmatprep.subr.bf16.mxu0 %v2355_v50  ;;  %v3245_v50 = vld [vmem:[#allocation48_spill] sm:$0xff]  ;;  %v3252_v55 = vld [vmem:[#allocation11_spill] sm:$0xff] }
 0x186   :  { %1769 = vmatprep.subr.bf16.mxu1 %v3172_v61  ;;  %v3253_v61 = vld [vmem:[#allocation12_spill] sm:$0xff] }
 0x187   :  { %v2094_v28 = vld [vmem:[#allocation5 + $0xdc] ss:$12 sps:$4 sm:$0xff]   ;;  %v2095_v15 = vld [vmem:[#allocation5 + $0xd8] ss:$12 sps:$4 sm:$0xff]  }
 0x188   :  { %1244 = vmatpush2.bf16.msra.mxu0 %v2361_v52  ;;  %v3247_v52 = vld [vmem:[#allocation15_spill] sm:$0xff] }
 0x189   :  { %1770 = vmatpush3.bf16.msra.mxu1 %v3173_v62  ;;  %1245 = vmatprep.subr.bf16.mxu0 %v2367_v54  ;;  %v3248_v54 = vld [vmem:[#allocation35_spill] sm:$0xff] }
 0x18a   :  { %1771 = vmatprep.subr.bf16.mxu1 %v3174_v43 }
 0x18c   :  { %1246 = vmatpush2.bf16.msra.mxu0 %v2373_v56 }
 0x18d   :  { %1772 = vmatpush3.bf16.msra.mxu1 %v3175_v60  ;;  %1247 = vmatprep.subr.bf16.mxu0 %v2379_v58  ;;  %v3251_v60 = vld [vmem:[#allocation36_spill] sm:$0xff] }
 0x18e   :  { %1773 = vmatprep.subr.bf16.mxu1 %v3213_v37  ;;  %v2089_v37 = vld [vmem:[#allocation5 + $0x120] ss:$12 sps:$4 sm:$0xff]  }
 0x190   :  { %1248 = vmatpush2.bf16.msra.mxu0 %v2387_v63  ;;  %v3249_v63 = vld [vmem:[#allocation30_spill] sm:$0xff] }
 0x191   :  { %1774 = vmatpush3.bf16.msra.mxu1 %v3214_v0  ;;  %1249 = vmatprep.subr.bf16.mxu0 %v2396_v36  ;;  %v2929_v36 = vpack.c.bf16 %v1054_v42, %v1054_v42  ;;  %v3260_v0 = vld [vmem:[#allocation24_spill] sm:$0xff]  ;;  %v3270_v42 = vld [vmem:[#allocation43_spill] sm:$0xff] }
 0x192   :  { %1775 = vmatprep.subr.bf16.mxu1 %v3215_v22  ;;  %v2090_v22 = vld [vmem:[#allocation5 + $0x10c] ss:$12 sps:$4 sm:$0xff]  }
 0x194   :  { %1250 = vmatpush2.bf16.msra.mxu0 %v2404_v51  ;;  %v3246_v51 = vld [vmem:[#allocation46_spill] sm:$0xff] }
 0x195   :  { %1776 = vmatpush3.bf16.msra.mxu1 %v3216_v40  ;;  %1251 = vmatprep.subr.bf16.mxu0 %v2417_v59  ;;  %v3261_v40 = vld [vmem:[#allocation25_spill] sm:$0xff] }
 0x196   :  { %1777 = vmatprep.subr.bf16.mxu1 %v2419_v33  ;;  %v3250_v33 = vld [vmem:[#allocation18_spill] sm:$0xff] }
 0x198   :  { %1252 = vmatpush2.bf16.msra.mxu0 %v3192_v1 }
 0x199   :  { %1778 = vmatpush3.bf16.msra.mxu1 %v2427_v45  ;;  %1905 = vmatprep.subr.bf16.mxu0 %v3193_v21 }
 0x19a   :  { %1383 = vmatprep.subr.bf16.mxu1 %v2776_v57  ;;  %v2091_v57 = vld [vmem:[#allocation5 + $0x108] ss:$12 sps:$4 sm:$0xff]  }
 0x19b   :  { %1254 = vmatmul.mubr.bf16.vlgmr.msra.gmra.mxu0 %v2705_v6 }
 0x19c   :  { %v942_v43 = vpop.f32.mrf.mxu1  ;;  %1336 = vmatmul.mubr.bf16.vlgmr.msra.gmra.mxu1 %v2705_v6  ;;  %1906 = vmatpush3.bf16.msra.mxu0 %v3194_v11 }
 0x19d   :  { %1384 = vmatpush1.bf16.msra.mxu1 %v2785_v7  ;;  %1907 = vmatprep.subr.bf16.mxu0 %v3193_v21  ;;  %v2092_v7 = vld [vmem:[#allocation5 + $0xf4] ss:$12 sps:$4 sm:$0xff]  }
 0x19e   :  { %v944_v44 = vpop.f32.mrf.mxu1  ;;  %1385 = vmatprep.subr.bf16.mxu1 %v2791_v31  ;;  %1921 = vmatprep.mubr.msk.bf16.mxu0 %vm2193_vm0, %v3193_v21  ;;  %v3264_v31 = vld [vmem:[#allocation33_spill] sm:$0xff] }
 0x19f   :  { %1415 = vmatprep.mubr.bf16.mxu1 %v2929_v36  ;;  %v1050_v26 = vunpack.c.l.bf16 %v3264_v31 }
 0x1a0   :  { %v946_v1 = vpop.f32.mrf.mxu1  ;;  %1908 = vmatpush3.bf16.msra.mxu0 %v3195_v39 }
 0x1a1   :  { %1386 = vmatpush1.bf16.msra.mxu1 %v2804_v47  ;;  %1909 = vmatprep.subr.bf16.mxu0 %v3193_v21  ;;  %v3257_v47 = vld [vmem:[#allocation19_spill] sm:$0xff] }
 0x1a2   :  { %v947_v45 = vpop.f32.mrf.mxu1  ;;  %1387 = vmatprep.subr.bf16.mxu1 %v2810_v20  ;;  %v3258_v20 = vld [vmem:[#allocation20_spill] sm:$0xff] }
 0x1a4   :  { %1910 = vmatpush3.bf16.msra.mxu0 %v3196_v3  ;;  %v3255_v3 = vld [vmem:[#allocation14_spill] sm:$0xff] }
 0x1a5   :  { %1388 = vmatpush1.bf16.msra.mxu1 %v2816_v14  ;;  %1911 = vmatprep.subr.bf16.mxu0 %v3193_v21  ;;  %v3266_v14 = vld [vmem:[#allocation49_spill] sm:$0xff] }
 0x1a6   :  { %1389 = vmatprep.subr.bf16.mxu1 %v2822_v25  ;;  %v3267_v25 = vld [vmem:[#allocation41_spill] sm:$0xff] }
 0x1a8   :  { %1912 = vmatpush3.bf16.msra.mxu0 %v2454_v5  ;;  %v3242_v5 = vld [vmem:[#allocation47_spill] sm:$0xff] }
 0x1a9   :  { %1390 = vmatpush1.bf16.msra.mxu1 %v2828_v23  ;;  %1913 = vmatprep.subr.bf16.mxu0 %v3193_v21  ;;  %v1053_v23 = vsub.f32 %v3268_v38, %v1050_v26 }
 0x1aa   :  { %1391 = vmatprep.subr.bf16.mxu1 %v2834_v16  ;;  %v1055_v16 = vsub.f32 %v3269_v30, %v1052_v35 }
 0x1ab   :  { %v2993_v1 = vpack.c.bf16 %v1053_v23, %v1053_v23 }
 0x1ac   :  { %1914 = vmatpush3.bf16.msra.mxu0 %v3197_v19  ;;  %v2995_v45 = vpack.c.bf16 %v1055_v16, %v1055_v16 }
 0x1ad   :  { %1392 = vmatpush1.bf16.msra.mxu1 %v2840_v34  ;;  %1915 = vmatprep.subr.bf16.mxu0 %v3193_v21  ;;  %v2093_v34 = vld [vmem:[#allocation5 + $0xf0] ss:$12 sps:$4 sm:$0xff]  }
 0x1ae   :  { %1393 = vmatprep.subr.bf16.mxu1 %v2846_v24  ;;  %v2088_v24 = vld [vmem:[#allocation5 + $0x124] ss:$12 sps:$4 sm:$0xff]  }
 0x1b0   :  { %1916 = vmatpush3.bf16.msra.mxu0 %v3198_v9  ;;  %v2085_v9 = vld [vmem:[#allocation5 + $0x150] ss:$12 sps:$4 sm:$0xff]  }
 0x1b1   :  { %1394 = vmatpush1.bf16.msra.mxu1 %v2852_v13  ;;  %1917 = vmatprep.subr.bf16.mxu0 %v3193_v21  ;;  %v2087_v13 = vld [vmem:[#allocation5 + $0x138] ss:$12 sps:$4 sm:$0xff]  }
 0x1b2   :  { %1395 = vmatprep.subr.bf16.mxu1 %v2858_v2 }
 0x1b4   :  { %1918 = vmatpush3.bf16.msra.mxu0 %v3242_v5  ;;  %v2097_v5 = vld [vmem:[#allocation5 + $0xc0] ss:$12 sps:$4 sm:$0xff]  }
 0x1b5   :  { %1396 = vmatpush1.bf16.msra.mxu1 %v3243_v46  ;;  %1919 = vmatprep.subr.bf16.mxu0 %v3193_v21  ;;  %v3272_v46 = vld [vmem:[#allocation13_spill] sm:$0xff] }
 0x1b6   :  { %1397 = vmatprep.subr.bf16.mxu1 %v3244_v48  ;;  %v3273_v48 = vld [vmem:[#allocation16_spill] sm:$0xff] }
 0x1b8   :  { %1920 = vmatpush3.bf16.msra.mxu0 %v3245_v50 }
 0x1b9   :  { %1398 = vmatpush1.bf16.msra.mxu1 %v3246_v51  ;;  %1424 = vmatprep.subr.bf16.mxu0 %v3248_v54  ;;  %v2098_v54 = vld [vmem:[#allocation5 + $0xb0] ss:$12 sps:$4 sm:$0xff]  }
 0x1ba   :  { %1399 = vmatprep.subr.bf16.mxu1 %v3247_v52 }
 0x1bb   :  { %v901_v56 = vpop.f32.mrf.mxu0  ;;  %1922 = vmatmul.mubr.bf16.vlgmr.msra.gmra.mxu0 %v3249_v63 }
 0x1bc   :  { %v2968_v58 = vpop.f32.mrf.mxu1  ;;  %v943_v59 = vadd.f32 %v942_v43, %v901_v56  ;;  %1425 = vmatpush1.bf16.msra.mxu0 %v3251_v60  ;;  %1456 = vmatprep.mubr.bf16.mxu0 %v3254_v18  ;;  %v2096_v43 = vld [vmem:[#allocation5 + $0xc4] ss:$12 sps:$4 sm:$0xff]  }
 0x1bd   :  { %1400 = vmatpush2.bf16.msra.mxu1 %v3250_v33  ;;  %v903_v17 = vpop.f32.mrf.mxu0  ;;  %1426 = vmatprep.subr.bf16.mxu0 %v3252_v55  ;;  %v2099_v56 = vld [vmem:[#allocation5 + $0x230] ss:$12 sps:$4 sm:$0xff]   ;;  %v2101_v60 = vld [vmem:[#allocation5 + $0x98] ss:$12 sps:$4 sm:$0xff]   ;;  %v2104_v55 = vld [vmem:[#allocation5 + $0x80] ss:$12 sps:$4 sm:$0xff]  }
 0x1be   :  { %v1718_v49 = vpop.f32.mrf.mxu1  ;;  %1401 = vmatprep.subr.bf16.mxu1 %v2084_v53  ;;  %v1029_v62 = vadd.f32 %v943_v59, %v3253_v61  ;;  %v945_v12 = vadd.f32 %v944_v44, %v903_v17  ;;  %v3271_v44 = vld [vmem:[#allocation45_spill] sm:$0xff]  ;;  %v2110_v18 = vld [vmem:[#allocation5 + $0x50] ss:$12 sps:$4 sm:$0xff]  }
 0x1bf   :  { %v905_v11 = vpop.f32.mrf.mxu0  ;;  %v1719_v50 = vadd.f32 %v1718_v49, %v2968_v58  ;;  %v2100_v59 = vld [vmem:[#allocation5 + $0x158] ss:$12 sps:$4 sm:$0xff]   ;;  %v2103_v53 = vld [vmem:[#allocation5 + $0x140] ss:$12 sps:$4 sm:$0xff]  }
 0x1c0   :  { %v1720_v39 = vpop.f32.mrf.mxu1  ;;  %1032 = vst [vmem:[#allocation7] sm:$0xff] %v1029_v62  ;;  %v1030_v19 = vadd.f32 %v945_v12, %v3255_v3  ;;  %1427 = vmatpush1.bf16.msra.mxu0 %v3256_v8  ;;  %v2102_v17 = vld [vmem:[#allocation5 + $0x218] ss:$12 sps:$4 sm:$0xff]   ;;  %v2105_v61 = vld [vmem:[#allocation5 + $0x200] ss:$12 sps:$4 sm:$0xff]  }
 0x1c1   :  { %1402 = vmatpush2.bf16.msra.mxu1 %v2085_v9  ;;  %v906_v2 = vpop.f32.mrf.mxu0  ;;  %1428 = vmatprep.subr.bf16.mxu0 %v3257_v47  ;;  %v2108_v62 = vld [vmem:[#allocation5 + $0x1e8] ss:$12 sps:$4 sm:$0xff]   ;;  %v2109_v12 = vld [vmem:[#allocation5 + $0x110] ss:$12 sps:$4 sm:$0xff]   ;;  %v2112_v39 = vld [vmem:[#allocation5 + $0xf8] ss:$12 sps:$4 sm:$0xff]  }
 0x1c2   :  { %v1721_v6 = vpop.f32.mrf.mxu1  ;;  %1403 = vmatprep.subr.bf16.mxu1 %v2086_v10  ;;  %1033 = vst [vmem:[#allocation7 + $0x10] sm:$0xff] %v1030_v19  ;;  %v2111_v11 = vld [vmem:[#allocation5 + $0x1d0] ss:$12 sps:$4 sm:$0xff]   ;;  %v2113_v3 = vld [vmem:[#allocation5 + $0x38] ss:$12 sps:$4 sm:$0xff]  }
 0x1c3   :  { %v2114_v19 = vld [vmem:[#allocation5 + $0x1b8] ss:$12 sps:$4 sm:$0xff]   ;;  %v2115_v9 = vld [vmem:[#allocation5 + $0xe0] ss:$12 sps:$4 sm:$0xff]   ;;  %v2118_v6 = vld [vmem:[#allocation5 + $0xc8] ss:$12 sps:$4 sm:$0xff]  }
 0x1c4   :  { %1429 = vmatpush1.bf16.msra.mxu0 %v3258_v20  ;;  %v2116_v8 = vld [vmem:[#allocation5 + $0x20] ss:$12 sps:$4 sm:$0xff]   ;;  %v2119_v10 = vld [vmem:[#allocation5 + $0x8] ss:$12 sps:$4 sm:$0xff]  }
 0x1c5   :  { %1404 = vmatpush2.bf16.msra.mxu1 %v2087_v13  ;;  %1430 = vmatprep.subr.bf16.mxu0 %v3259_v29  ;;  %v2117_v2 = vld [vmem:[#allocation5 + $0x1a0] ss:$12 sps:$4 sm:$0xff]   ;;  %v2120_v47 = vld [vmem:[#allocation5 + $0x188] ss:$12 sps:$4 sm:$0xff]  }
 0x1c6   :  { %1405 = vmatprep.subr.bf16.mxu1 %v2088_v24 }
 0x1c8   :  { %1431 = vmatpush1.bf16.msra.mxu0 %v3260_v0 }
 0x1c9   :  { %1406 = vmatpush2.bf16.msra.mxu1 %v2089_v37  ;;  %1432 = vmatprep.subr.bf16.mxu0 %v3261_v40 }
 0x1ca   :  { %1407 = vmatprep.subr.bf16.mxu1 %v2090_v22 }
 0x1cc   :  { %1433 = vmatpush1.bf16.msra.mxu0 %v3262_v4 }
 0x1cd   :  { %1408 = vmatpush2.bf16.msra.mxu1 %v2091_v57  ;;  %1434 = vmatprep.subr.bf16.mxu0 %v3263_v27 }
 0x1ce   :  { %1409 = vmatprep.subr.bf16.mxu1 %v2092_v7 }
 0x1d0   :  { %1435 = vmatpush1.bf16.msra.mxu0 %v3266_v14 }
 0x1d1   :  { %1410 = vmatpush2.bf16.msra.mxu1 %v2093_v34  ;;  %1436 = vmatprep.subr.bf16.mxu0 %v3267_v25 }
 0x1d2   :  { %1411 = vmatprep.subr.bf16.mxu1 %v2094_v28 }
 0x1d4   :  { %1437 = vmatpush1.bf16.msra.mxu0 %v3270_v42 }
 0x1d5   :  { %1412 = vmatpush2.bf16.msra.mxu1 %v2095_v15  ;;  %1438 = vmatprep.subr.bf16.mxu0 %v3271_v44 }
 0x1d6   :  { %1413 = vmatprep.subr.bf16.mxu1 %v2096_v43 }
 0x1d8   :  { %1439 = vmatpush1.bf16.msra.mxu0 %v3272_v46 }
 0x1d9   :  { %1414 = vmatpush2.bf16.msra.mxu1 %v2097_v5  ;;  %1794 = vmatprep.subr.bf16.mxu0 %v3273_v48 }
 0x1da   :  { %1925 = vmatprep.subr.bf16.mxu1 %v3193_v21 }
 0x1db   :  { %v1023_v51 = vpop.f32.mrf.mxu0  ;;  %1457 = vmatmul.mubr.bf16.vlgmr.msra.gmra.mxu0 %v2995_v45 }
 0x1dc   :  { %1416 = vmatmul.mubr.bf16.vlgmr.msra.gmra.mxu1 %v2993_v1  ;;  %v1024_v52 = vadd.f32 %v1719_v50, %v1023_v51  ;;  %1795 = vmatpush3.bf16.msra.mxu0 %v2098_v54 }
 0x1dd   :  { %1926 = vmatpush3.bf16.msra.mxu1 %v2099_v56  ;;  %v1883_v63 = vpop.f32.mrf.mxu0  ;;  %1796 = vmatprep.subr.bf16.mxu0 %v2100_v59 }
 0x1de   :  { %1927 = vmatprep.subr.bf16.mxu1 %v3193_v21  ;;  %v1031_v33 = vadd.f32 %v1024_v52, %v2901_v41  ;;  %1497 = vmatprep.mubr.bf16.mxu0 %v2929_v36  ;;  %v2106_v41 = vld [vmem:[#allocation5 + $0x128] ss:$12 sps:$4 sm:$0xff]  }
 0x1df   :  { %1941 = vmatprep.mubr.msk.bf16.mxu1 %vm2193_vm0, %v3193_v21  ;;  %v1026_v58 = vpop.f32.mrf.mxu0  ;;  %v2107_v36 = vld [vmem:[#allocation5 + $0x68] ss:$12 sps:$4 sm:$0xff]  }
 0x1e0   :  { %1034 = vst [vmem:[#allocation7 + $0x20] sm:$0xff] %v1031_v33  ;;  %1797 = vmatpush3.bf16.msra.mxu0 %v2101_v60 }
 0x1e1   :  { %1928 = vmatpush3.bf16.msra.mxu1 %v2102_v17  ;;  %v1884_v49 = vpop.f32.mrf.mxu0  ;;  %1798 = vmatprep.subr.bf16.mxu0 %v2103_v53 }
 0x1e2   :  { %1929 = vmatprep.subr.bf16.mxu1 %v3193_v21 }
 0x1e4   :  { %1799 = vmatpush3.bf16.msra.mxu0 %v2104_v55 }
 0x1e5   :  { %1930 = vmatpush3.bf16.msra.mxu1 %v2105_v61  ;;  %1800 = vmatprep.subr.bf16.mxu0 %v2106_v41 }
 0x1e6   :  { %1931 = vmatprep.subr.bf16.mxu1 %v3193_v21 }
 0x1e8   :  { %1801 = vmatpush3.bf16.msra.mxu0 %v2107_v36 }
 0x1e9   :  { %1932 = vmatpush3.bf16.msra.mxu1 %v2108_v62  ;;  %1802 = vmatprep.subr.bf16.mxu0 %v2109_v12 }
 0x1ea   :  { %1933 = vmatprep.subr.bf16.mxu1 %v3193_v21 }
 0x1ec   :  { %1803 = vmatpush3.bf16.msra.mxu0 %v2110_v18 }
 0x1ed   :  { %1934 = vmatpush3.bf16.msra.mxu1 %v2111_v11  ;;  %1804 = vmatprep.subr.bf16.mxu0 %v2112_v39 }
 0x1ee   :  { %1935 = vmatprep.subr.bf16.mxu1 %v3193_v21 }
 0x1f0   :  { %1805 = vmatpush3.bf16.msra.mxu0 %v2113_v3 }
 0x1f1   :  { %1936 = vmatpush3.bf16.msra.mxu1 %v2114_v19  ;;  %1806 = vmatprep.subr.bf16.mxu0 %v2115_v9 }
 0x1f2   :  { %1937 = vmatprep.subr.bf16.mxu1 %v3193_v21 }
 0x1f4   :  { %1807 = vmatpush3.bf16.msra.mxu0 %v2116_v8 }
 0x1f5   :  { %1938 = vmatpush3.bf16.msra.mxu1 %v2117_v2  ;;  %1808 = vmatprep.subr.bf16.mxu0 %v2118_v6 }
 0x1f6   :  { %1939 = vmatprep.subr.bf16.mxu1 %v3193_v21 }
 0x1f8   :  { %1809 = vmatpush3.bf16.msra.mxu0 %v2119_v10 }
 0x1f9   :  { %1940 = vmatpush3.bf16.msra.mxu1 %v2120_v47 }
 0x1fb   :  { %v1134_v20 = vpop.f32.mrf.mxu0  ;;  %1498 = vmatmul.mubr.bf16.vlgmr.msra.gmra.mxu0 %v2993_v1 }
 0x1fc   :  { %v1093_v13 = vpop.f32.mrf.mxu1  ;;  %1942 = vmatmul.mubr.bf16.vlgmr.msra.gmra.mxu1 %v2995_v45 }
 0x1fd   :  { %v1135_v24 = vadd.f32 %v1134_v20, %v1093_v13  ;;  %v1136_v37 = vpop.f32.mrf.mxu0 }
 0x1fe   :  { %v1095_v29 = vpop.f32.mrf.mxu1 }
 0x1ff   :  { %v1137_v0 = vadd.f32 %v1136_v37, %v1095_v29  ;;  %v1138_v40 = vpop.f32.mrf.mxu0 }
 0x200   :  { %v1097_v22 = vpop.f32.mrf.mxu1 }
 0x201   :  { %v1139_v4 = vpop.f32.mrf.mxu0 }
 0x202   :  { %v1098_v57 = vpop.f32.mrf.mxu1 }
 0x21b   :  { %v1748_v7 = vpop.f32.mrf.mxu0 }
 0x21c   :  { %v1215_v21 = vpop.f32.mrf.mxu1 }
 0x21d   :  { %v1749_v27 = vpop.f32.mrf.mxu0 }
 0x21e   :  { %v1903_v31 = vpop.f32.mrf.mxu1  ;;  %v1750_v26 = vadd.f32 %v1749_v27, %v1748_v7 }
 0x21f   :  { %v1751_v32 = vpop.f32.mrf.mxu0 }
 0x220   :  { %v1218_v35 = vpop.f32.mrf.mxu1  ;;  %v1216_v34 = vadd.f32 %v1750_v26, %v1215_v21 }
 0x221   :  { %v1752_v14 = vpop.f32.mrf.mxu0 }
 0x222   :  { %v1904_v28 = vpop.f32.mrf.mxu1 }
 0x23c   :  { %v1296_v25 = vpop.f32.mrf.mxu1 }
 0x23e   :  { %v1298_v38 = vpop.f32.mrf.mxu1 }
 0x240   :  { %v1300_v23 = vpop.f32.mrf.mxu1 }
 0x242   :  { %v1301_v30 = vpop.f32.mrf.mxu1 }
 0x25b   :  { %v1255_v16 = vpop.f32.mrf.mxu0 }
 0x25c   :  { %v1779_v15 = vpop.f32.mrf.mxu1  ;;  %v1256_v42 = vadd.f32 %v1255_v16, %v1135_v24 }
 0x25d   :  { %v1257_v43 = vpop.f32.mrf.mxu0 }
 0x25e   :  { %v1780_v44 = vpop.f32.mrf.mxu1  ;;  %v1297_v1 = vadd.f32 %v1296_v25, %v1256_v42  ;;  %v1258_v45 = vadd.f32 %v1257_v43, %v1137_v0 }
 0x25f   :  { %v1781_v5 = vadd.f32 %v1780_v44, %v1779_v15  ;;  %v1259_v46 = vpop.f32.mrf.mxu0 }
 0x260   :  { %v1782_v48 = vpop.f32.mrf.mxu1  ;;  %v1299_v50 = vadd.f32 %v1298_v38, %v1258_v45 }
 0x261   :  { %v1338_v51 = vadd.f32 %v1781_v5, %v1216_v34  ;;  %v1260_v52 = vpop.f32.mrf.mxu0 }
 0x262   :  { %v1783_v54 = vpop.f32.mrf.mxu1 }
 0x27b   :  { %v1377_v56 = vpop.f32.mrf.mxu0 }
 0x27c   :  { %v1378_v63 = vadd.f32 %v1377_v56, %v1338_v51 }
 0x27d   :  { %v1923_v59 = vpop.f32.mrf.mxu0 }
 0x27f   :  { %v1380_v33 = vpop.f32.mrf.mxu0 }
 0x281   :  { %v1924_v58 = vpop.f32.mrf.mxu0 }
 0x29b   :  { %v1458_v17 = vpop.f32.mrf.mxu0 }
 0x29c   :  { %v1417_v60 = vpop.f32.mrf.mxu1 }
 0x29d   :  { %v1459_v49 = vadd.f32 %v1458_v17, %v1417_v60  ;;  %v1460_v55 = vpop.f32.mrf.mxu0 }
 0x29e   :  { %v1419_v53 = vpop.f32.mrf.mxu1 }
 0x29f   :  { %v1545_v61 = vadd.f32 %v1459_v49, %v1297_v1  ;;  %v1461_v41 = vadd.f32 %v1460_v55, %v1419_v53  ;;  %v1462_v62 = vpop.f32.mrf.mxu0 }
 0x2a0   :  { %v1421_v36 = vpop.f32.mrf.mxu1 }
 0x2a1   :  { %1548 = vst [vmem:[#allocation7 + $0x8] sm:$0xff] %v1545_v61  ;;  %v1546_v12 = vadd.f32 %v1461_v41, %v1299_v50  ;;  %v1463_v11 = vpop.f32.mrf.mxu0 }
 0x2a2   :  { %v1422_v18 = vpop.f32.mrf.mxu1 }
 0x2a3   :  { %1549 = vst [vmem:[#allocation7 + $0x18] sm:$0xff] %v1546_v12 }
 0x2bb   :  { %v1810_v39 = vpop.f32.mrf.mxu0 }
 0x2bc   :  { %v1539_v3 = vpop.f32.mrf.mxu1 }
 0x2bd   :  { %v1811_v19 = vpop.f32.mrf.mxu0 }
 0x2be   :  { %v1943_v9 = vpop.f32.mrf.mxu1  ;;  %v1812_v8 = vadd.f32 %v1811_v19, %v1810_v39 }
 0x2bf   :  { %v1813_v2 = vpop.f32.mrf.mxu0 }
 0x2c0   :  { %v1542_v6 = vpop.f32.mrf.mxu1  ;;  %v1540_v10 = vadd.f32 %v1812_v8, %v1539_v3 }
 0x2c1   :  { %v1814_v47 = vpop.f32.mrf.mxu0 }
 0x2c2   :  { %v1944_v13 = vpop.f32.mrf.mxu1  ;;  %v1547_v20 = vadd.f32 %v1540_v10, %v1378_v63 }
 0x2c4   :  { %1550 = vst [vmem:[#allocation7 + $0x28] sm:$0xff] %v1547_v20 }
 0x2c5   :  { %2172 = shalt.err (!%p2169_p0)
}
 0x2c6   :  { %1560 = dma.vmem_to_hbm [thread:$0]  %s1558_s1, 768, %s3021_s2, [#allocation4]  }
 0x2c7   :  { %2185 = dma.done.wait [#allocation4], 768  }
 0x2c8   :  { %2186 = vsyncadd [#allocation4], 4294966528 }
 0x2c9   :  { %1564 = vsyncpa [#allocation3], 1 }
 0x2ca   :  { %1565 = vsyncpa [#allocation6], 1 }
 0x2cb   :  { %1566 = vsyncpa [#allocation4], 1 }

</bundles_post_ra>
